<compile_context>
chip_gen: v6e
topology: v6e:2x2x1
jax: 0.10.0
libtpu: 0.0.40
codegen_flags: <defaults>
</compile_context>

<pallas_src>
import jax
import jax.numpy as jnp
import numpy as np
from jax import lax
from jax.experimental import pallas as pl
from jax.experimental.pallas import tpu as pltpu

EPS = 1e-5


# ---------------------------------------------------------------------------
# Host-side constant preparation
# ---------------------------------------------------------------------------
def _banded_conv_weights(w_oihw, W):
    """PyTorch (Cout, Cin, 3, 3) conv kernel -> (3, W*Cin, W*Cout) banded matmul weights.

    For vertical tap dy, `rows_dy @ mat[dy]` (rows_dy = channels-last, width-flattened
    input rows taken at vertical offset dy-1) produces lane-dense conv output rows
    (rows, W*Cout).  Horizontal taps and the width zero-padding are folded into the band
    structure, so no width halo is ever materialized.
    """
    w = np.asarray(w_oihw, np.float32)
    Co, Ci, KH, KW = w.shape
    mat = np.zeros((KH, W * Ci, W * Co), np.float32)
    for dy in range(KH):
        for dx in range(KW):
            tap = w[:, :, dy, dx].T                      # (Ci, Co)
            for wo in range(W):
                wi = wo + dx - 1                         # input column feeding output wo
                if 0 <= wi < W:
                    mat[dy, wi * Ci:(wi + 1) * Ci, wo * Co:(wo + 1) * Co] = tap
    return jnp.asarray(mat)


def _channel_rep(C, W):
    """(C, W*C) 0/1 replication matrix: vec_c @ rep tiles a per-channel row across the W
    lane-tiles of the lane-dense layout; row @ rep.T folds it back (sum over W)."""
    return np.tile(np.eye(C, dtype=np.float32), (1, W))


# ---------------------------------------------------------------------------
# Kernel helpers
# ---------------------------------------------------------------------------
def _band_conv(flat, w_ref, mask_top, mask_bot):
    """3x3 'same' conv on a lane-dense (rows, W*Ci) slab as 3 full-slab MXU matmuls.

    Vertical taps are aligned with pltpu.roll along the row (sublane) axis plus 0/1
    image-boundary masks — no sublane-offset slices, no height-halo scratch.  Matmul
    operands are cast to the band-weight dtype (bf16 on v6e/v7x for 2x MXU rate);
    accumulation and all elementwise math stay f32 (v5e-friendly).
    """
    R = flat.shape[0]
    w0, w1, w2 = w_ref[0], w_ref[1], w_ref[2]
    dt = w0.dtype
    # up[r] = input row r-1 (zeroed at the top row of each image)
    up = (pltpu.roll(flat, shift=1, axis=0) * mask_top).astype(dt)
    # dn[r] = input row r+1 (zeroed at the bottom row of each image)
    dn = (pltpu.roll(flat, shift=R - 1, axis=0) * mask_bot).astype(dt)
    out = jnp.dot(up, w0, preferred_element_type=jnp.float32)
    out = out + jnp.dot(flat.astype(dt), w1, preferred_element_type=jnp.float32)
    out = out + jnp.dot(dn, w2, preferred_element_type=jnp.float32)
    return out


def _bn_scale_shift(flat, ones_row, inv_n, gamma, beta, rep, rept):
    """One-pass BatchNorm batch stats on a lane-dense (rows, W*C) tensor, folded into a
    single per-lane (scale, shift) pair so normalization is one FMA per element.

    Row sums go through ones-row MXU matmuls (the MXU is idle here) instead of sublane
    XLU reductions; the (W*C)->C fold and C->(W*C) expansion use tiny 0/1 replication
    matrices.  TODO(synk): one-pass E[x^2]-E[x]^2 variance is fine at these magnitudes;
    switch to a two-pass reduction if tiles / input magnitudes grow.
    """
    rs = jnp.dot(ones_row, flat, preferred_element_type=jnp.float32)           # (1, W*C)
    rss = jnp.dot(ones_row, flat * flat, preferred_element_type=jnp.float32)   # (1, W*C)
    mean = jnp.dot(rs, rept, preferred_element_type=jnp.float32) * inv_n       # (1, C)
    msq = jnp.dot(rss, rept, preferred_element_type=jnp.float32) * inv_n       # (1, C)
    var = msq - mean * mean               # biased variance (BatchNorm2d training stats)
    scale_c = gamma * lax.rsqrt(var + EPS)
    shift_c = beta - mean * scale_c
    scale = jnp.dot(scale_c, rep, preferred_element_type=jnp.float32)          # (1, W*C)
    shift = jnp.dot(shift_c, rep, preferred_element_type=jnp.float32)
    return scale, shift


# ---------------------------------------------------------------------------
# Fused FiLM kernel
# ---------------------------------------------------------------------------
def film_fused_kernel(x_ref, w1_ref, w2_ref, b2_ref, y_ref,
                      fw_w_ref, fb_w_ref,
                      g1_ref, be1_ref, g2_ref, be2_ref,
                      rep1_ref, rep1t_ref, rep2_ref, rep2t_ref,
                      o_ref):
    R = x_ref.shape[0]                  # B * H rows
    B = y_ref.shape[0]
    H = R // B
    Cout = b2_ref.shape[1]
    WCout = rep2_ref.shape[1]
    W = WCout // Cout
    inv_n = 1.0 / float(R * W)          # per-channel element count for BN stats

    # ---- hoisted constants, shared by both convs / both BNs --------------------------
    row_in_img = lax.broadcasted_iota(jnp.int32, (R, 1), 0) % H
    mask_top = (row_in_img != 0).astype(jnp.float32)       # kills the dy=0 tap at image row 0
    mask_bot = (row_in_img != H - 1).astype(jnp.float32)   # kills the dy=2 tap at image row H-1
    ones_row = jnp.ones((1, R), jnp.float32)               # MXU row-reduction vector

    # ---- FiLM linear layers (hoisted off the conv critical path).  Linear biases are
    #      structurally zero (initialize_parameters); conv2's bias is folded into the
    #      FiLM shift:  (conv2 + b2) * fw + fb  ==  conv2 * fw + (fb + b2 * fw).
    film_w = jnp.dot(y_ref[...], fw_w_ref[...], preferred_element_type=jnp.float32)   # (B, Cout)
    film_b = jnp.dot(y_ref[...], fb_w_ref[...], preferred_element_type=jnp.float32)
    film_b = film_b + b2_ref[...] * film_w

    # ---- conv1 (bias dropped: a per-channel constant cancels under BN1) + BN1 + ReLU.
    c1 = _band_conv(x_ref[...], w1_ref, mask_top, mask_bot)                   # (R, W*Cimm) f32
    s1, t1 = _bn_scale_shift(c1, ones_row, inv_n, g1_ref[...], be1_ref[...],
                             rep1_ref[...], rep1t_ref[...])
    h = jnp.maximum(c1 * s1 + t1, 0.0)                                        # (R, W*Cimm)

    # ---- conv2 + FiLM modulation (per-image FMA; the (R,WC)<->(B,H,WC) reshapes are
    #      layout-free because H % 8 == 0 and WC % 128 == 0 — no tile boundary crossed).
    c2 = _band_conv(h, w2_ref, mask_top, mask_bot)                            # (R, W*Cout) f32
    fw = jnp.dot(film_w, rep2_ref[...], preferred_element_type=jnp.float32)   # (B, W*Cout)
    fb = jnp.dot(film_b, rep2_ref[...], preferred_element_type=jnp.float32)
    mod = (c2.reshape(B, H, WCout) * fw[:, None, :]
           + fb[:, None, :]).reshape(R, WCout)

    # ---- BN2 + ReLU, lane-dense (R, W*Cout) store (256 full lanes -> unmasked vst).
    s2, t2 = _bn_scale_shift(mod, ones_row, inv_n, g2_ref[...], be2_ref[...],
                             rep2_ref[...], rep2t_ref[...])
    o_ref[...] = jnp.maximum(mod * s2 + t2, 0.0)


# ---------------------------------------------------------------------------
# Wrappers
# ---------------------------------------------------------------------------
def film_forward_nhwc(x_nhwc, y, params):
    """Fused FiLM forward on channels-last input. x_nhwc: (B, H, W, Cin), y: (B, F).
    Returns (B, H, W, Cout).  Conv matmuls run in params['w*_band'].dtype (f32 or bf16)."""
    B, H, W, Cin = x_nhwc.shape
    Cout = params["b2"].shape[1]

    # Lane-dense (rows, W*Cin) slab; NO host-side halo padding (the 1-row height halo is
    # handled in-kernel with rolls + boundary masks), so the input makes exactly one
    # HBM -> VMEM trip.  The reshape is a row-major view.
    xflat = x_nhwc.astype(jnp.float32).reshape(B * H, W * Cin)

    out_slab = pl.pallas_call(
        film_fused_kernel,
        out_shape=jax.ShapeDtypeStruct((B * H, W * Cout), jnp.float32),
        in_specs=[pl.BlockSpec(memory_space=pltpu.MemorySpace.VMEM)] * 15,
        out_specs=pl.BlockSpec(memory_space=pltpu.MemorySpace.VMEM),
    )(xflat,
      params["w1_band"], params["w2_band"], params["b2"], y.astype(jnp.float32),
      params["lw_w"], params["lb_w"],
      params["g1"], params["be1"], params["g2"], params["be2"],
      params["rep1"], params["rep1t"], params["rep2"], params["rep2t"])

    return out_slab.reshape(B, H, W, Cout)


def film_forward(x_nchw, y, params):
    """PyTorch-layout entry point (NCHW in / NCHW out).  Callers already in NHWC should
    use film_forward_nhwc directly and skip the two layout transposes."""
    x_nhwc = jnp.transpose(x_nchw, (0, 2, 3, 1))
    out = film_forward_nhwc(x_nhwc, y, params)
    return jnp.transpose(out, (0, 3, 1, 2))


# ---------------------------------------------------------------------------
# Parameters / reference
# ---------------------------------------------------------------------------
def make_params(key, in_features, out_features, in_channels, imm_channels, W):
    ks = jax.random.split(key, 6)
    # Conv weights: small normals in PyTorch (Cout, Cin, 3, 3) layout (synthetic).
    w1 = 0.1 * jax.random.normal(ks[0], (imm_channels, in_channels, 3, 3), jnp.float32)
    b1 = 0.1 * jax.random.normal(ks[1], (imm_channels,), jnp.float32)
    w2 = 0.1 * jax.random.normal(ks[2], (out_features, imm_channels, 3, 3), jnp.float32)
    b2 = 0.1 * jax.random.normal(ks[3], (out_features,), jnp.float32)
    # Linear init reproducing initialize_parameters: row-normalized normal(0,1), zero bias.
    lw = jax.random.normal(ks[4], (out_features, in_features), jnp.float32)
    lw = lw / jnp.sqrt(jnp.sum(lw ** 2, axis=1, keepdims=True))
    lb = jax.random.normal(ks[5], (out_features, in_features), jnp.float32)
    lb = lb / jnp.sqrt(jnp.sum(lb ** 2, axis=1, keepdims=True))
    rep1 = _channel_rep(imm_channels, W)
    rep2 = _channel_rep(out_features, W)
    return dict(
        # raw PyTorch-layout weights (pure-JAX reference only)
        w1_oihw=w1, b1=b1.reshape(1, imm_channels),
        w2_oihw=w2, b2=b2.reshape(1, out_features),
        # kernel-side banded / lane-dense constants
        w1_band=_banded_conv_weights(w1, W),
        w2_band=_banded_conv_weights(w2, W),
        rep1=jnp.asarray(rep1), rep1t=jnp.asarray(rep1.T),
        rep2=jnp.asarray(rep2), rep2t=jnp.asarray(rep2.T),
        # Linear weights pre-transposed to (in_features, out_features); biases are zero
        # by construction (initialize_parameters) -> only the reference uses them.
        lw_w=lw.T, lw_b=jnp.zeros((1, out_features), jnp.float32),
        lb_w=lb.T, lb_b=jnp.zeros((1, out_features), jnp.float32),
        # BatchNorm affine params (default init: gamma=1, beta=0)
        g1=jnp.ones((1, imm_channels), jnp.float32),
        be1=jnp.zeros((1, imm_channels), jnp.float32),
        g2=jnp.ones((1, out_features), jnp.float32),
        be2=jnp.zeros((1, out_features), jnp.float32),
    )


def reference_forward(x_nchw, y, params):
    """Pure-JAX reference with identical semantics (f32 conv/BN/FiLM)."""
    x = jnp.transpose(x_nchw, (0, 2, 3, 1)).astype(jnp.float32)

    def conv(xin, w_oihw, b):
        w = jnp.transpose(w_oihw, (2, 3, 1, 0))                  # OIHW -> HWIO
        o = lax.conv_general_dilated(xin, w, (1, 1), "SAME",
                                     dimension_numbers=("NHWC", "HWIO", "NHWC"))
        return o + b.reshape(1, 1, 1, -1)

    def bn_relu(v, g, be):
        mean = jnp.mean(v, axis=(0, 1, 2), keepdims=True)
        var = jnp.mean((v - mean) ** 2, axis=(0, 1, 2), keepdims=True)
        vn = (v - mean) / jnp.sqrt(var + EPS)
        return jnp.maximum(vn * g.reshape(1, 1, 1, -1) + be.reshape(1, 1, 1, -1), 0.0)

    h = bn_relu(conv(x, params["w1_oihw"], params["b1"]), params["g1"], params["be1"])
    c2 = conv(h, params["w2_oihw"], params["b2"])
    fw = y @ params["lw_w"] + params["lw_b"]
    fb = y @ params["lb_w"] + params["lb_b"]
    mod = c2 * fw[:, None, None, :] + fb[:, None, None, :]
    out = bn_relu(mod, params["g2"], params["be2"])
    return jnp.transpose(out, (0, 3, 1, 2))


if __name__ == "__main__":
    B, Cin, Cimm, Cout, H, W, F = 2, 4, 8, 16, 16, 16, 32
    key = jax.random.PRNGKey(0)
    kx, ky, kp = jax.random.split(key, 3)
    x = jax.random.normal(kx, (B, Cin, H, W), jnp.float32)       # PyTorch NCHW input
    y = jax.random.normal(ky, (B, F), jnp.float32)
    params = make_params(kp, F, Cout, Cin, Cimm, W)

    # f32 conv matmuls: exact-semantics check against the pure-JAX reference.
    out = jax.block_until_ready(film_forward(x, y, params))
    ref = reference_forward(x, y, params)
    np.testing.assert_allclose(np.asarray(out), np.asarray(ref), atol=5e-4, rtol=5e-4)

    # bf16 conv-matmul variant (v6e/v7x fast path: 2x MXU rate, half the band-weight
    # VMEM/HBM bytes; all elementwise / BN math stays f32).  bf16's 8-bit mantissa gives
    # ~1e-2-scale post-BN rounding errors, so the tolerance is widened accordingly.
    params_bf16 = dict(params,
                       w1_band=params["w1_band"].astype(jnp.bfloat16),
                       w2_band=params["w2_band"].astype(jnp.bfloat16))
    out_bf16 = jax.block_until_ready(film_forward(x, y, params_bf16))
    np.testing.assert_allclose(np.asarray(out_bf16), np.asarray(ref), atol=7.5e-2, rtol=7.5e-2)

    print("KERNEL_OK")
</pallas_src>

<mosaic_0001>
module attributes {stable_mosaic.version = 11 : i64} {
  func.func @film_fused_kernel(%arg0: memref<32x64xf32, #tpu.memory_space<vmem>>, %arg1: memref<3x64x128xf32, #tpu.memory_space<vmem>>, %arg2: memref<3x128x256xf32, #tpu.memory_space<vmem>>, %arg3: memref<1x16xf32, #tpu.memory_space<vmem>>, %arg4: memref<2x32xf32, #tpu.memory_space<vmem>>, %arg5: memref<32x16xf32, #tpu.memory_space<vmem>>, %arg6: memref<32x16xf32, #tpu.memory_space<vmem>>, %arg7: memref<1x8xf32, #tpu.memory_space<vmem>>, %arg8: memref<1x8xf32, #tpu.memory_space<vmem>>, %arg9: memref<1x16xf32, #tpu.memory_space<vmem>>, %arg10: memref<1x16xf32, #tpu.memory_space<vmem>>, %arg11: memref<8x128xf32, #tpu.memory_space<vmem>>, %arg12: memref<128x8xf32, #tpu.memory_space<vmem>>, %arg13: memref<16x256xf32, #tpu.memory_space<vmem>>, %arg14: memref<256x16xf32, #tpu.memory_space<vmem>>, %arg15: memref<32x256xf32, #tpu.memory_space<vmem>>) attributes {dimension_semantics = [], scalar_prefetch = 0 : i64, scratch_operands = 0 : i64, tpu.core_type = #tpu.core_type<tc>} {
    %0 = tpu.iota {dimensions = array<i32: 0>} : vector<32x1xi32>
    %c16_i32 = arith.constant 16 : i32
    %c0_i32 = arith.constant 0 : i32
    %1 = arith.cmpi eq, %c16_i32, %c0_i32 : i32
    %c1_i32 = arith.constant 1 : i32
    %2 = arith.select %1, %c1_i32, %c16_i32 : i32
    %3 = vector.broadcast %2 : i32 to vector<32x1xi32>
    %4 = arith.remsi %0, %3 : vector<32x1xi32>
    %c0_i32_0 = arith.constant 0 : i32
    %5 = vector.broadcast %c0_i32_0 : i32 to vector<32x1xi32>
    %6 = arith.cmpi ne, %4, %5 : vector<32x1xi32>
    %c0_i32_1 = arith.constant 0 : i32
    %7 = vector.broadcast %c0_i32_1 : i32 to vector<32x1xi32>
    %8 = arith.cmpi slt, %4, %7 : vector<32x1xi32>
    %c0_i32_2 = arith.constant 0 : i32
    %9 = arith.cmpi slt, %2, %c0_i32_2 : i32
    %10 = vector.broadcast %9 : i1 to vector<32x1xi1>
    %11 = vector.broadcast %10 : vector<32x1xi1> to vector<32x1xi1>
    %12 = arith.xori %8, %11 : vector<32x1xi1>
    %13 = arith.andi %12, %6 : vector<32x1xi1>
    %14 = vector.broadcast %2 : i32 to vector<32x1xi32>
    %15 = arith.addi %4, %14 : vector<32x1xi32>
    %16 = arith.select %13, %15, %4 : vector<32x1xi1>, vector<32x1xi32>
    %c0_i32_3 = arith.constant 0 : i32
    %17 = vector.broadcast %c0_i32_3 : i32 to vector<32x1xi32>
    %18 = arith.cmpi ne, %16, %17 : vector<32x1xi32>
    %19 = arith.extui %18 : vector<32x1xi1> to vector<32x1xi32>
    %20 = arith.sitofp %19 : vector<32x1xi32> to vector<32x1xf32>
    %c15_i32 = arith.constant 15 : i32
    %21 = vector.broadcast %c15_i32 : i32 to vector<32x1xi32>
    %22 = arith.cmpi ne, %16, %21 : vector<32x1xi32>
    %23 = arith.extui %22 : vector<32x1xi1> to vector<32x1xi32>
    %24 = arith.sitofp %23 : vector<32x1xi32> to vector<32x1xf32>
    %cst = arith.constant 1.000000e+00 : f32
    %25 = vector.broadcast %cst : f32 to vector<1x32xf32>
    %c0 = arith.constant 0 : index
    %c0_4 = arith.constant 0 : index
    %26 = vector.load %arg4[%c0, %c0_4] : memref<2x32xf32, #tpu.memory_space<vmem>>, vector<2x32xf32>
    %c0_5 = arith.constant 0 : index
    %c0_6 = arith.constant 0 : index
    %27 = vector.load %arg5[%c0_5, %c0_6] : memref<32x16xf32, #tpu.memory_space<vmem>>, vector<32x16xf32>
    %cst_7 = arith.constant dense<0.000000e+00> : vector<2x16xf32>
    %28 = tpu.matmul %26, %27, %cst_7 {dimension_numbers = #tpu.dot_dimension_numbers<[1], [0], [0], [1], [0, 0, 1, 1], [], []>} : vector<2x32xf32>, vector<32x16xf32>, vector<2x16xf32> -> vector<2x16xf32>
    %c0_8 = arith.constant 0 : index
    %c0_9 = arith.constant 0 : index
    %29 = vector.load %arg4[%c0_8, %c0_9] : memref<2x32xf32, #tpu.memory_space<vmem>>, vector<2x32xf32>
    %c0_10 = arith.constant 0 : index
    %c0_11 = arith.constant 0 : index
    %30 = vector.load %arg6[%c0_10, %c0_11] : memref<32x16xf32, #tpu.memory_space<vmem>>, vector<32x16xf32>
    %cst_12 = arith.constant dense<0.000000e+00> : vector<2x16xf32>
    %31 = tpu.matmul %29, %30, %cst_12 {dimension_numbers = #tpu.dot_dimension_numbers<[1], [0], [0], [1], [0, 0, 1, 1], [], []>} : vector<2x32xf32>, vector<32x16xf32>, vector<2x16xf32> -> vector<2x16xf32>
    %c0_13 = arith.constant 0 : index
    %c0_14 = arith.constant 0 : index
    %32 = vector.load %arg3[%c0_13, %c0_14] : memref<1x16xf32, #tpu.memory_space<vmem>>, vector<1x16xf32>
    %33 = vector.broadcast %32 : vector<1x16xf32> to vector<2x16xf32>
    %34 = arith.mulf %33, %28 : vector<2x16xf32>
    %35 = arith.addf %31, %34 : vector<2x16xf32>
    %c0_15 = arith.constant 0 : index
    %c0_16 = arith.constant 0 : index
    %36 = vector.load %arg0[%c0_15, %c0_16] : memref<32x64xf32, #tpu.memory_space<vmem>>, vector<32x64xf32>
    %c0_17 = arith.constant 0 : index
    %c0_18 = arith.constant 0 : index
    %c0_19 = arith.constant 0 : index
    %37 = vector.load %arg1[%c0_17, %c0_18, %c0_19] : memref<3x64x128xf32, #tpu.memory_space<vmem>>, vector<1x64x128xf32>
    %38 = vector.shape_cast %37 : vector<1x64x128xf32> to vector<64x128xf32>
    %c1 = arith.constant 1 : index
    %c0_20 = arith.constant 0 : index
    %c0_21 = arith.constant 0 : index
    %39 = vector.load %arg1[%c1, %c0_20, %c0_21] : memref<3x64x128xf32, #tpu.memory_space<vmem>>, vector<1x64x128xf32>
    %40 = vector.shape_cast %39 : vector<1x64x128xf32> to vector<64x128xf32>
    %c2 = arith.constant 2 : index
    %c0_22 = arith.constant 0 : index
    %c0_23 = arith.constant 0 : index
    %41 = vector.load %arg1[%c2, %c0_22, %c0_23] : memref<3x64x128xf32, #tpu.memory_space<vmem>>, vector<1x64x128xf32>
    %42 = vector.shape_cast %41 : vector<1x64x128xf32> to vector<64x128xf32>
    %c1_i32_24 = arith.constant 1 : i32
    %43 = tpu.dynamic_rotate %36 by %c1_i32_24 dim 0 : vector<32x64xf32>, i32 -> vector<32x64xf32>
    %44 = vector.broadcast %20 : vector<32x1xf32> to vector<32x64xf32>
    %45 = arith.mulf %43, %44 : vector<32x64xf32>
    %c31_i32 = arith.constant 31 : i32
    %46 = tpu.dynamic_rotate %36 by %c31_i32 dim 0 : vector<32x64xf32>, i32 -> vector<32x64xf32>
    %47 = vector.broadcast %24 : vector<32x1xf32> to vector<32x64xf32>
    %48 = arith.mulf %46, %47 : vector<32x64xf32>
    %cst_25 = arith.constant dense<0.000000e+00> : vector<32x128xf32>
    %49 = tpu.matmul %45, %38, %cst_25 {dimension_numbers = #tpu.dot_dimension_numbers<[1], [0], [0], [1], [0, 0, 1, 1], [], []>} : vector<32x64xf32>, vector<64x128xf32>, vector<32x128xf32> -> vector<32x128xf32>
    %cst_26 = arith.constant dense<0.000000e+00> : vector<32x128xf32>
    %50 = tpu.matmul %36, %40, %cst_26 {dimension_numbers = #tpu.dot_dimension_numbers<[1], [0], [0], [1], [0, 0, 1, 1], [], []>} : vector<32x64xf32>, vector<64x128xf32>, vector<32x128xf32> -> vector<32x128xf32>
    %51 = arith.addf %49, %50 : vector<32x128xf32>
    %cst_27 = arith.constant dense<0.000000e+00> : vector<32x128xf32>
    %52 = tpu.matmul %48, %42, %cst_27 {dimension_numbers = #tpu.dot_dimension_numbers<[1], [0], [0], [1], [0, 0, 1, 1], [], []>} : vector<32x64xf32>, vector<64x128xf32>, vector<32x128xf32> -> vector<32x128xf32>
    %53 = arith.addf %51, %52 : vector<32x128xf32>
    %c0_28 = arith.constant 0 : index
    %c0_29 = arith.constant 0 : index
    %54 = vector.load %arg7[%c0_28, %c0_29] : memref<1x8xf32, #tpu.memory_space<vmem>>, vector<1x8xf32>
    %c0_30 = arith.constant 0 : index
    %c0_31 = arith.constant 0 : index
    %55 = vector.load %arg8[%c0_30, %c0_31] : memref<1x8xf32, #tpu.memory_space<vmem>>, vector<1x8xf32>
    %c0_32 = arith.constant 0 : index
    %c0_33 = arith.constant 0 : index
    %56 = vector.load %arg11[%c0_32, %c0_33] : memref<8x128xf32, #tpu.memory_space<vmem>>, vector<8x128xf32>
    %c0_34 = arith.constant 0 : index
    %c0_35 = arith.constant 0 : index
    %57 = vector.load %arg12[%c0_34, %c0_35] : memref<128x8xf32, #tpu.memory_space<vmem>>, vector<128x8xf32>
    %cst_36 = arith.constant dense<0.000000e+00> : vector<1x128xf32>
    %58 = tpu.matmul %25, %53, %cst_36 {dimension_numbers = #tpu.dot_dimension_numbers<[1], [0], [0], [1], [0, 0, 1, 1], [], []>} : vector<1x32xf32>, vector<32x128xf32>, vector<1x128xf32> -> vector<1x128xf32>
    %59 = arith.mulf %53, %53 : vector<32x128xf32>
    %cst_37 = arith.constant dense<0.000000e+00> : vector<1x128xf32>
    %60 = tpu.matmul %25, %59, %cst_37 {dimension_numbers = #tpu.dot_dimension_numbers<[1], [0], [0], [1], [0, 0, 1, 1], [], []>} : vector<1x32xf32>, vector<32x128xf32>, vector<1x128xf32> -> vector<1x128xf32>
    %cst_38 = arith.constant dense<0.000000e+00> : vector<1x8xf32>
    %61 = tpu.matmul %58, %57, %cst_38 {dimension_numbers = #tpu.dot_dimension_numbers<[1], [0], [0], [1], [0, 0, 1, 1], [], []>} : vector<1x128xf32>, vector<128x8xf32>, vector<1x8xf32> -> vector<1x8xf32>
    %cst_39 = arith.constant 0.001953125 : f32
    %62 = vector.broadcast %cst_39 : f32 to vector<1x8xf32>
    %63 = arith.mulf %61, %62 : vector<1x8xf32>
    %cst_40 = arith.constant dense<0.000000e+00> : vector<1x8xf32>
    %64 = tpu.matmul %60, %57, %cst_40 {dimension_numbers = #tpu.dot_dimension_numbers<[1], [0], [0], [1], [0, 0, 1, 1], [], []>} : vector<1x128xf32>, vector<128x8xf32>, vector<1x8xf32> -> vector<1x8xf32>
    %cst_41 = arith.constant 0.001953125 : f32
    %65 = vector.broadcast %cst_41 : f32 to vector<1x8xf32>
    %66 = arith.mulf %64, %65 : vector<1x8xf32>
    %67 = arith.mulf %63, %63 : vector<1x8xf32>
    %68 = arith.subf %66, %67 : vector<1x8xf32>
    %cst_42 = arith.constant 9.99999974E-6 : f32
    %69 = vector.broadcast %cst_42 : f32 to vector<1x8xf32>
    %70 = arith.addf %68, %69 : vector<1x8xf32>
    %71 = math.rsqrt %70 : vector<1x8xf32>
    %72 = arith.mulf %54, %71 : vector<1x8xf32>
    %73 = arith.mulf %63, %72 : vector<1x8xf32>
    %74 = arith.subf %55, %73 : vector<1x8xf32>
    %cst_43 = arith.constant dense<0.000000e+00> : vector<1x128xf32>
    %75 = tpu.matmul %72, %56, %cst_43 {dimension_numbers = #tpu.dot_dimension_numbers<[1], [0], [0], [1], [0, 0, 1, 1], [], []>} : vector<1x8xf32>, vector<8x128xf32>, vector<1x128xf32> -> vector<1x128xf32>
    %cst_44 = arith.constant dense<0.000000e+00> : vector<1x128xf32>
    %76 = tpu.matmul %74, %56, %cst_44 {dimension_numbers = #tpu.dot_dimension_numbers<[1], [0], [0], [1], [0, 0, 1, 1], [], []>} : vector<1x8xf32>, vector<8x128xf32>, vector<1x128xf32> -> vector<1x128xf32>
    %77 = vector.broadcast %75 : vector<1x128xf32> to vector<32x128xf32>
    %78 = arith.mulf %53, %77 : vector<32x128xf32>
    %79 = vector.broadcast %76 : vector<1x128xf32> to vector<32x128xf32>
    %80 = arith.addf %78, %79 : vector<32x128xf32>
    %cst_45 = arith.constant 0.000000e+00 : f32
    %81 = vector.broadcast %cst_45 : f32 to vector<32x128xf32>
    %82 = arith.maximumf %80, %81 : vector<32x128xf32>
    %c0_46 = arith.constant 0 : index
    %c0_47 = arith.constant 0 : index
    %c0_48 = arith.constant 0 : index
    %83 = vector.load %arg2[%c0_46, %c0_47, %c0_48] : memref<3x128x256xf32, #tpu.memory_space<vmem>>, vector<1x128x256xf32>
    %84 = vector.shape_cast %83 : vector<1x128x256xf32> to vector<128x256xf32>
    %c1_49 = arith.constant 1 : index
    %c0_50 = arith.constant 0 : index
    %c0_51 = arith.constant 0 : index
    %85 = vector.load %arg2[%c1_49, %c0_50, %c0_51] : memref<3x128x256xf32, #tpu.memory_space<vmem>>, vector<1x128x256xf32>
    %86 = vector.shape_cast %85 : vector<1x128x256xf32> to vector<128x256xf32>
    %c2_52 = arith.constant 2 : index
    %c0_53 = arith.constant 0 : index
    %c0_54 = arith.constant 0 : index
    %87 = vector.load %arg2[%c2_52, %c0_53, %c0_54] : memref<3x128x256xf32, #tpu.memory_space<vmem>>, vector<1x128x256xf32>
    %88 = vector.shape_cast %87 : vector<1x128x256xf32> to vector<128x256xf32>
    %c1_i32_55 = arith.constant 1 : i32
    %89 = tpu.dynamic_rotate %82 by %c1_i32_55 dim 0 : vector<32x128xf32>, i32 -> vector<32x128xf32>
    %90 = vector.broadcast %20 : vector<32x1xf32> to vector<32x128xf32>
    %91 = arith.mulf %89, %90 : vector<32x128xf32>
    %c31_i32_56 = arith.constant 31 : i32
    %92 = tpu.dynamic_rotate %82 by %c31_i32_56 dim 0 : vector<32x128xf32>, i32 -> vector<32x128xf32>
    %93 = vector.broadcast %24 : vector<32x1xf32> to vector<32x128xf32>
    %94 = arith.mulf %92, %93 : vector<32x128xf32>
    %cst_57 = arith.constant dense<0.000000e+00> : vector<32x256xf32>
    %95 = tpu.matmul %91, %84, %cst_57 {dimension_numbers = #tpu.dot_dimension_numbers<[1], [0], [0], [1], [0, 0, 1, 1], [], []>} : vector<32x128xf32>, vector<128x256xf32>, vector<32x256xf32> -> vector<32x256xf32>
    %cst_58 = arith.constant dense<0.000000e+00> : vector<32x256xf32>
    %96 = tpu.matmul %82, %86, %cst_58 {dimension_numbers = #tpu.dot_dimension_numbers<[1], [0], [0], [1], [0, 0, 1, 1], [], []>} : vector<32x128xf32>, vector<128x256xf32>, vector<32x256xf32> -> vector<32x256xf32>
    %97 = arith.addf %95, %96 : vector<32x256xf32>
    %cst_59 = arith.constant dense<0.000000e+00> : vector<32x256xf32>
    %98 = tpu.matmul %94, %88, %cst_59 {dimension_numbers = #tpu.dot_dimension_numbers<[1], [0], [0], [1], [0, 0, 1, 1], [], []>} : vector<32x128xf32>, vector<128x256xf32>, vector<32x256xf32> -> vector<32x256xf32>
    %99 = arith.addf %97, %98 : vector<32x256xf32>
    %c0_60 = arith.constant 0 : index
    %c0_61 = arith.constant 0 : index
    %100 = vector.load %arg13[%c0_60, %c0_61] : memref<16x256xf32, #tpu.memory_space<vmem>>, vector<16x256xf32>
    %cst_62 = arith.constant dense<0.000000e+00> : vector<2x256xf32>
    %101 = tpu.matmul %28, %100, %cst_62 {dimension_numbers = #tpu.dot_dimension_numbers<[1], [0], [0], [1], [0, 0, 1, 1], [], []>} : vector<2x16xf32>, vector<16x256xf32>, vector<2x256xf32> -> vector<2x256xf32>
    %c0_63 = arith.constant 0 : index
    %c0_64 = arith.constant 0 : index
    %102 = vector.load %arg13[%c0_63, %c0_64] : memref<16x256xf32, #tpu.memory_space<vmem>>, vector<16x256xf32>
    %cst_65 = arith.constant dense<0.000000e+00> : vector<2x256xf32>
    %103 = tpu.matmul %35, %102, %cst_65 {dimension_numbers = #tpu.dot_dimension_numbers<[1], [0], [0], [1], [0, 0, 1, 1], [], []>} : vector<2x16xf32>, vector<16x256xf32>, vector<2x256xf32> -> vector<2x256xf32>
    %104 = vector.shape_cast %99 : vector<32x256xf32> to vector<2x16x256xf32>
    %105 = vector.shape_cast %101 : vector<2x256xf32> to vector<2x1x256xf32>
    %106 = vector.broadcast %105 : vector<2x1x256xf32> to vector<2x16x256xf32>
    %107 = arith.mulf %104, %106 : vector<2x16x256xf32>
    %108 = vector.shape_cast %103 : vector<2x256xf32> to vector<2x1x256xf32>
    %109 = vector.broadcast %108 : vector<2x1x256xf32> to vector<2x16x256xf32>
    %110 = arith.addf %107, %109 : vector<2x16x256xf32>
    %111 = vector.shape_cast %110 : vector<2x16x256xf32> to vector<32x256xf32>
    %c0_66 = arith.constant 0 : index
    %c0_67 = arith.constant 0 : index
    %112 = vector.load %arg9[%c0_66, %c0_67] : memref<1x16xf32, #tpu.memory_space<vmem>>, vector<1x16xf32>
    %c0_68 = arith.constant 0 : index
    %c0_69 = arith.constant 0 : index
    %113 = vector.load %arg10[%c0_68, %c0_69] : memref<1x16xf32, #tpu.memory_space<vmem>>, vector<1x16xf32>
    %c0_70 = arith.constant 0 : index
    %c0_71 = arith.constant 0 : index
    %114 = vector.load %arg13[%c0_70, %c0_71] : memref<16x256xf32, #tpu.memory_space<vmem>>, vector<16x256xf32>
    %c0_72 = arith.constant 0 : index
    %c0_73 = arith.constant 0 : index
    %115 = vector.load %arg14[%c0_72, %c0_73] : memref<256x16xf32, #tpu.memory_space<vmem>>, vector<256x16xf32>
    %cst_74 = arith.constant dense<0.000000e+00> : vector<1x256xf32>
    %116 = tpu.matmul %25, %111, %cst_74 {dimension_numbers = #tpu.dot_dimension_numbers<[1], [0], [0], [1], [0, 0, 1, 1], [], []>} : vector<1x32xf32>, vector<32x256xf32>, vector<1x256xf32> -> vector<1x256xf32>
    %117 = arith.mulf %111, %111 : vector<32x256xf32>
    %cst_75 = arith.constant dense<0.000000e+00> : vector<1x256xf32>
    %118 = tpu.matmul %25, %117, %cst_75 {dimension_numbers = #tpu.dot_dimension_numbers<[1], [0], [0], [1], [0, 0, 1, 1], [], []>} : vector<1x32xf32>, vector<32x256xf32>, vector<1x256xf32> -> vector<1x256xf32>
    %cst_76 = arith.constant dense<0.000000e+00> : vector<1x16xf32>
    %119 = tpu.matmul %116, %115, %cst_76 {dimension_numbers = #tpu.dot_dimension_numbers<[1], [0], [0], [1], [0, 0, 1, 1], [], []>} : vector<1x256xf32>, vector<256x16xf32>, vector<1x16xf32> -> vector<1x16xf32>
    %cst_77 = arith.constant 0.001953125 : f32
    %120 = vector.broadcast %cst_77 : f32 to vector<1x16xf32>
    %121 = arith.mulf %119, %120 : vector<1x16xf32>
    %cst_78 = arith.constant dense<0.000000e+00> : vector<1x16xf32>
    %122 = tpu.matmul %118, %115, %cst_78 {dimension_numbers = #tpu.dot_dimension_numbers<[1], [0], [0], [1], [0, 0, 1, 1], [], []>} : vector<1x256xf32>, vector<256x16xf32>, vector<1x16xf32> -> vector<1x16xf32>
    %cst_79 = arith.constant 0.001953125 : f32
    %123 = vector.broadcast %cst_79 : f32 to vector<1x16xf32>
    %124 = arith.mulf %122, %123 : vector<1x16xf32>
    %125 = arith.mulf %121, %121 : vector<1x16xf32>
    %126 = arith.subf %124, %125 : vector<1x16xf32>
    %cst_80 = arith.constant 9.99999974E-6 : f32
    %127 = vector.broadcast %cst_80 : f32 to vector<1x16xf32>
    %128 = arith.addf %126, %127 : vector<1x16xf32>
    %129 = math.rsqrt %128 : vector<1x16xf32>
    %130 = arith.mulf %112, %129 : vector<1x16xf32>
    %131 = arith.mulf %121, %130 : vector<1x16xf32>
    %132 = arith.subf %113, %131 : vector<1x16xf32>
    %cst_81 = arith.constant dense<0.000000e+00> : vector<1x256xf32>
    %133 = tpu.matmul %130, %114, %cst_81 {dimension_numbers = #tpu.dot_dimension_numbers<[1], [0], [0], [1], [0, 0, 1, 1], [], []>} : vector<1x16xf32>, vector<16x256xf32>, vector<1x256xf32> -> vector<1x256xf32>
    %cst_82 = arith.constant dense<0.000000e+00> : vector<1x256xf32>
    %134 = tpu.matmul %132, %114, %cst_82 {dimension_numbers = #tpu.dot_dimension_numbers<[1], [0], [0], [1], [0, 0, 1, 1], [], []>} : vector<1x16xf32>, vector<16x256xf32>, vector<1x256xf32> -> vector<1x256xf32>
    %135 = vector.broadcast %133 : vector<1x256xf32> to vector<32x256xf32>
    %136 = arith.mulf %111, %135 : vector<32x256xf32>
    %137 = vector.broadcast %134 : vector<1x256xf32> to vector<32x256xf32>
    %138 = arith.addf %136, %137 : vector<32x256xf32>
    %cst_83 = arith.constant 0.000000e+00 : f32
    %139 = vector.broadcast %cst_83 : f32 to vector<32x256xf32>
    %140 = arith.maximumf %138, %139 : vector<32x256xf32>
    %c0_84 = arith.constant 0 : index
    %c0_85 = arith.constant 0 : index
    %141 = vector.load %arg15[%c0_84, %c0_85] : memref<32x256xf32, #tpu.memory_space<vmem>>, vector<32x256xf32>
    tpu.vector_store %arg15[%c0_84, %c0_85], %140 {strides = array<i32>} : memref<32x256xf32, #tpu.memory_space<vmem>>, vector<32x256xf32>,
    return
  }
}

</mosaic_0001>

<bundles_post_ra>
// kernel: tpu_custom_call.1
= control target key start
LH: loop header
LB: loop body
LE: loop exit
PB: predicated region body
PF: predicated region fallthrough
CT: control target
= control target key end

     0   :  { %20 = vsyncpa [#allocation3], 0  ;;  %s3681_s0 = inlined_call_operand.vmem [shape: f32[32,64], index: 0, kind: input, shape index: {}]   ;;  %s3682_s1 = inlined_call_operand.vmem [shape: f32[3,64,128], index: 1, kind: input, shape index: {}]   ;;  %s3683_s2 = inlined_call_operand.hbm [shape: f32[3,128,256], index: 2, kind: input, shape index: {}]   ;;  %s3684_s3 = inlined_call_operand.vmem [shape: f32[1,16], index: 3, kind: input, shape index: {}]   ;;  %s3685_s4 = inlined_call_operand.vmem [shape: f32[2,32], index: 4, kind: input, shape index: {}]   ;;  %s3686_s5 = inlined_call_operand.vmem [shape: f32[32,16], index: 5, kind: input, shape index: {}]   ;;  %s3687_s6 = inlined_call_operand.vmem [shape: f32[32,16], index: 6, kind: input, shape index: {}]   ;;  %s3688_s7 = inlined_call_operand.vmem [shape: f32[1,8], index: 7, kind: input, shape index: {}]   ;;  %s3689_s8 = inlined_call_operand.vmem [shape: f32[1,8], index: 8, kind: input, shape index: {}]   ;;  %s3690_s9 = inlined_call_operand.vmem [shape: f32[1,16], index: 9, kind: input, shape index: {}]   ;;  %s3691_s10 = inlined_call_operand.vmem [shape: f32[1,16], index: 10, kind: input, shape index: {}]   ;;  %s3692_s11 = inlined_call_operand.vmem [shape: f32[8,128], index: 11, kind: input, shape index: {}]   ;;  %s3693_s12 = inlined_call_operand.vmem [shape: f32[128,8], index: 12, kind: input, shape index: {}]   ;;  %s3694_s13 = inlined_call_operand.vmem [shape: f32[16,256], index: 13, kind: input, shape index: {}]   ;;  %s3695_s14 = inlined_call_operand.vmem [shape: f32[256,16], index: 14, kind: input, shape index: {}]   ;;  %s3696_s15 = inlined_call_operand.hbm [shape: f32[32,256], index: 15, kind: output, shape index: {}]  }
   0x1   :  { %21 = vsyncpa [#allocation4], 0  ;;  %s2794_s18 = smov [#allocation2]  }
   0x2   :  { %s31_s19 = sshll.u32 %s2794_s18, 4  ;;  %s32_s19 = int_to_ptr.vmem [resolvable:$true] %s31_s19 }
   0x3   :  { %s2758_s20 = scalar_lea.vmem %s32_s19, 12288  ;;  %p2763_p1 = scmp.lt.s32.totalorder %s32_s19, %s32_s19 }
   0x4   :  { %p2759_p0 = scmp.ne.s32.totalorder %s32_s19, %s2758_s20  ;;  %p2764_p2 = scmp.lt.s32.totalorder %s2758_s20, %s2758_s20 }
   0x6   :  { %p2765_p3 = por %p2764_p2, %p2763_p1 }
   0x8   :  { %p2766_p4 = pnand %p2765_p3, %p2759_p0 }
   0xa   :  { %2769 = shalt.err (!%p2766_p4)
}
   0xb   :  { %s2795_s21 = smov 256   ;;  %s2796_s22 = smov 16  }
   0xc   :  { %37 = dma.hbm_to_vmem [thread:$0]  %s3683_s2, 12288, %s32_s19, [#allocation3], %s2795_s21, %s2795_s21, %s2796_s22  }
   0xd   :  { %2790 = dma.done.wait [#allocation3], 12288  }
   0xe   :  { %2791 = vsyncadd [#allocation3], 4294955008  ;;  %v3697_v0 = vmov 0.0   ;;  %vm2798_vm0 = vmmov 0   ;;  %v146_v1 = vld [vmem:[%s3686_s5 + $0x18] sm:$0xff]  ;;  %v145_v3 = vld [vmem:[%s3686_s5 + $0x10] sm:$0xff]  ;;  %v65_v7 = vlaneseq }
   0xf   :  { %2548 = vmatprep.subr.mxu0 %v3697_v0  ;;  %2559 = vmatprep.subr.mxu1 %v3697_v0  ;;  %v224_v2 = vld [vmem:[%s3687_s6 + $0x18] sm:$0xff]  ;;  %v223_v4 = vld [vmem:[%s3687_s6 + $0x10] sm:$0xff]  ;;  %v144_v5 = vld [vmem:[%s3686_s5 + $0x8] sm:$0xff]  ;;  %vm147_vm1 = vcmask 261120   ;;  %vm359_vm5 = vcmask 523264   ;;  %vm970_vm9 = vcmask 64512  }
  0x10   :  { %2556 = vmatprep.mubr.msk.f32.mxu0 %vm2798_vm0, %v3697_v0  ;;  %2567 = vmatprep.mubr.msk.f32.mxu1 %vm2798_vm0, %v3697_v0  ;;  %v222_v6 = vld [vmem:[%s3687_s6 + $0x8] sm:$0xff]  ;;  %v143_v8 = vld [vmem:[%s3686_s5] sm:$0xff]  ;;  %v2353_v11 = vld [vmem:[%s3682_s1 + $0x78] sm:$0xff]  ;;  %v2933_v13 = vshrl.u32 %v65_v7, 7  ;;  %vm1538_vm10 = vcmask 130048  }
  0x11   :  { %2549 = vmatpush3.msra.mxu0 %v146_v1  ;;  %2560 = vmatpush3.msra.mxu1 %v224_v2  ;;  %v221_v9 = vld [vmem:[%s3687_s6] sm:$0xff]  ;;  %v314_v12 = vld [vmem:[%s3682_s1 + $0x38] sm:$0xff]  ;;  %v2352_v14 = vld [vmem:[%s3682_s1 + $0x70] sm:$0xff] }
  0x12   :  { %2550 = vmatprep.subr.mxu0 %v3697_v0  ;;  %2561 = vmatprep.subr.mxu1 %v3697_v0  ;;  %v142_v10 = vld [vmem:[%s3685_s4] sm:$0x3]  ;;  %v313_v15 = vld [vmem:[%s3682_s1 + $0x30] sm:$0xff]  ;;  %v2351_v16 = vld [vmem:[%s3682_s1 + $0x68] sm:$0xff]  ;;  %v68_v18 = vadd.s32 16, %v2933_v13  ;;  %v74_v20 = vand.u32 15, %v2933_v13 }
  0x13   :  { %2551 = vmatpush3.msra.mxu0 %v145_v3  ;;  %2562 = vmatpush3.msra.mxu1 %v223_v4  ;;  %v312_v17 = vld [vmem:[%s3682_s1 + $0x28] sm:$0xff]  ;;  %v2953_v19 = vld [vmem:[%s3681_s0] sm:$0xff]  ;;  %v2959_v21 = vld [vmem:[%s3681_s0 + $0x18] sm:$0xff]  ;;  %vm337_vm3 = vcmp.lt.s32.totalorder %v2933_v13, 1  ;;  %v67_v48 = vadd.s32 8, %v2933_v13  ;;  %vm350_vm6 = vcmp.lt.s32.totalorder %v2933_v13, 7 }
  0x14   :  { %2552 = vmatprep.subr.mxu0 %v3697_v0  ;;  %2563 = vmatprep.subr.mxu1 %v3697_v0  ;;  %v2350_v22 = vld [vmem:[%s3682_s1 + $0x60] sm:$0xff]  ;;  %v2349_v24 = vld [vmem:[%s3682_s1 + $0x58] sm:$0xff]  ;;  %v333_v26 = vrot.slane %v2953_v19, 7  ;;  %v336_v27 = vrot.slane %v2959_v21, 7  ;;  %v2978_v28 = vld [vmem:[%s3681_s0 + $0x10] sm:$0xff]  ;;  %v88_v29 = vand.u32 15, %v68_v18 }
  0x15   :  { %2553 = vmatpush3.msra.mxu0 %v144_v5  ;;  %2564 = vmatpush3.msra.mxu1 %v222_v6  ;;  %v311_v23 = vld [vmem:[%s3682_s1 + $0x20] sm:$0xff]  ;;  %v310_v25 = vld [vmem:[%s3682_s1 + $0x18] sm:$0xff]  ;;  %vm118_vm2 = vcmp.ne.s32.totalorder %v74_v20, 0  ;;  %v2348_v30 = vld [vmem:[%s3682_s1 + $0x50] sm:$0xff]  ;;  %v335_v33 = vrot.slane %v2978_v28, 7  ;;  %v346_v47 = vrot.slane %v2953_v19, 1 }
  0x16   :  { %2554 = vmatprep.subr.mxu0 %v3697_v0  ;;  %2565 = vmatprep.subr.mxu1 %v3697_v0  ;;  %v309_v31 = vld [vmem:[%s3682_s1 + $0x10] sm:$0xff]  ;;  %v2990_v32 = vld [vmem:[%s3681_s0 + $0x8] sm:$0xff]  ;;  %v3000_v36 = vsel %vm118_vm2, 1.0, %v3697_v0  ;;  %v341_v37 = vsel %vm337_vm3, %v336_v27, %v333_v26  ;;  %vm120_vm4 = vcmp.ne.s32.totalorder %v88_v29, 0  ;;  %v2346_v39 = vld [vmem:[%s3682_s1 + $0x40] sm:$0xff]  ;;  %v81_v53 = vand.u32 15, %v67_v48 }
  0x17   :  { %2555 = vmatpush3.msra.mxu0 %v143_v8  ;;  %2566 = vmatpush3.msra.mxu1 %v221_v9  ;;  %v2347_v34 = vld [vmem:[%s3682_s1 + $0x48] sm:$0xff]  ;;  %v334_v38 = vrot.slane %v2990_v32, 7  ;;  %v307_v40 = vld [vmem:[%s3682_s1] sm:$0xff]  ;;  %v342_v41 = vmul.f32 %v3000_v36, %v341_v37  ;;  %v3013_v42 = vsel %vm120_vm4, 1.0, %v3697_v0  ;;  %v2361_v45 = vld [vmem:[%s3682_s1 + $0xb8] sm:$0xff]  ;;  %v347_v49 = vrot.slane %v2990_v32, 1 }
  0x18   :  { %2557 = vmatmul.mubr.msk.f32.vlgmr.msra.gmra.mxu0 %vm147_vm1, %v142_v10  ;;  %2570 = vmatprep.subr.mxu0 %v2353_v11  ;;  %v308_v35 = vld [vmem:[%s3682_s1 + $0x8] sm:$0xff]  ;;  %v2360_v50 = vld [vmem:[%s3682_s1 + $0xb0] sm:$0xff]  ;;  %v338_v51 = vsel %vm337_vm3, %v335_v33, %v336_v27  ;;  %v69_v55 = vadd.s32 24, %v2933_v13  ;;  %v2358_v56 = vld [vmem:[%s3682_s1 + $0xa0] sm:$0xff]  ;;  %v348_v58 = vrot.slane %v2978_v28, 1  ;;  %vm131_vm7 = vcmp.ne.s32.totalorder %v81_v53, 15 }
  0x19   :  { %2592 = vmatprep.subr.mxu1 %v314_v12  ;;  %2568 = vmatmul.mubr.msk.f32.vlgmr.msra.gmra.mxu1 %vm147_vm1, %v142_v10  ;;  %v339_v43 = vsel %vm337_vm3, %v334_v38, %v335_v33  ;;  %v340_v44 = vsel %vm337_vm3, %v333_v26, %v334_v38  ;;  %v2359_v52 = vld [vmem:[%s3682_s1 + $0xa8] sm:$0xff]  ;;  %v353_v54 = vsel %vm350_vm6, %v346_v47, %v347_v49  ;;  %v2357_v57 = vld [vmem:[%s3682_s1 + $0x98] sm:$0xff]  ;;  %v2356_v60 = vld [vmem:[%s3682_s1 + $0x90] sm:$0xff]  ;;  %v3068_v62 = vsel %vm131_vm7, 1.0, %v3697_v0 }
  0x1a   :  { %2571 = vmatpush3.msra.mxu0 %v2353_v11  ;;  %2593 = vmatpush3.msra.mxu1 %v314_v12  ;;  %v344_v46 = vmul.f32 %v3013_v42, %v339_v43  ;;  %v95_v59 = vand.u32 15, %v69_v55  ;;  %v2355_v61 = vld [vmem:[%s3682_s1 + $0x88] sm:$0xff]  ;;  %v352_v63 = vsel %vm350_vm6, %v347_v49, %v348_v58  ;;  %v349_v1 = vrot.slane %v2959_v21, 1  ;;  %v2354_v2 = vld [vmem:[%s3682_s1 + $0x80] sm:$0xff]  ;;  %v3094_v8 = vld [vmem:[%s3693_s12 + $0x78] sm:$0xff] }
  0x1b   :  { %2572 = vmatprep.subr.mxu0 %v2352_v14  ;;  %2594 = vmatprep.subr.mxu1 %v313_v15  ;;  %v356_v3 = vmul.f32 %v3068_v62, %v352_v63  ;;  %v3099_v9 = vld [vmem:[%s3693_s12 + $0x70] sm:$0xff]  ;;  %v3106_v10 = vld [vmem:[%s3693_s12 + $0x68] sm:$0xff]  ;;  %v3113_v11 = vld [vmem:[%s3693_s12 + $0x60] sm:$0xff] }
  0x1c   :  { %2573 = vmatpush3.msra.mxu0 %v2352_v14  ;;  %2595 = vmatpush3.msra.mxu1 %v313_v15  ;;  %vm133_vm8 = vcmp.ne.s32.totalorder %v95_v59, 15  ;;  %v354_v5 = vsel %vm350_vm6, %v349_v1, %v346_v47  ;;  %v351_v6 = vsel %vm350_vm6, %v348_v58, %v349_v1  ;;  %v3120_v12 = vld [vmem:[%s3693_s12 + $0x58] sm:$0xff]  ;;  %v3127_v14 = vld [vmem:[%s3693_s12 + $0x50] sm:$0xff]  ;;  %v3134_v15 = vld [vmem:[%s3693_s12 + $0x48] sm:$0xff] }
  0x1d   :  { %2574 = vmatprep.subr.mxu0 %v2351_v16  ;;  %2596 = vmatprep.subr.mxu1 %v312_v17  ;;  %v3078_v4 = vsel %vm133_vm8, 1.0, %v3697_v0  ;;  %v3155_v18 = vld [vmem:[%s3693_s12 + $0x30] sm:$0xff]  ;;  %v3169_v20 = vld [vmem:[%s3693_s12 + $0x20] sm:$0xff]  ;;  %v1168_v63 = vld [vmem:[#allocation2 + $0xf8] sm:$0xff] }
  0x1e   :  { %2575 = vmatpush3.msra.mxu0 %v2351_v16  ;;  %2597 = vmatpush3.msra.mxu1 %v312_v17  ;;  %v358_v7 = vmul.f32 %v3078_v4, %v354_v5  ;;  %v3141_v16 = vld [vmem:[%s3693_s12 + $0x40] sm:$0xff]  ;;  %v3148_v17 = vld [vmem:[%s3693_s12 + $0x38] sm:$0xff] }
  0x1f   :  { %2576 = vmatprep.subr.mxu0 %v2350_v22  ;;  %2598 = vmatprep.subr.mxu1 %v311_v23  ;;  %v658_v55 = vld [vmem:[%s3693_s12] sm:$0xff] }
  0x20   :  { %2577 = vmatpush3.msra.mxu0 %v2350_v22  ;;  %2599 = vmatpush3.msra.mxu1 %v311_v23  ;;  %v3183_v22 = vld [vmem:[%s3693_s12 + $0x10] sm:$0xff]  ;;  %v3190_v23 = vld [vmem:[%s3693_s12 + $0x8] sm:$0xff] }
  0x21   :  { %2578 = vmatprep.subr.mxu0 %v2349_v24  ;;  %2600 = vmatprep.subr.mxu1 %v310_v25 }
  0x22   :  { %2579 = vmatpush3.msra.mxu0 %v2349_v24  ;;  %2601 = vmatpush3.msra.mxu1 %v310_v25 }
  0x23   :  { %2580 = vmatprep.subr.mxu0 %v2348_v30  ;;  %2602 = vmatprep.subr.mxu1 %v309_v31 }
  0x24   :  { %2581 = vmatpush3.msra.mxu0 %v2348_v30  ;;  %2603 = vmatpush3.msra.mxu1 %v309_v31 }
  0x25   :  { %2582 = vmatprep.subr.mxu0 %v2347_v34  ;;  %2604 = vmatprep.subr.mxu1 %v308_v35 }
  0x26   :  { %2583 = vmatpush3.msra.mxu0 %v2347_v34  ;;  %2605 = vmatpush3.msra.mxu1 %v308_v35 }
  0x27   :  { %2584 = vmatprep.subr.mxu0 %v2346_v39  ;;  %2606 = vmatprep.subr.mxu1 %v307_v40 }
  0x28   :  { %2585 = vmatpush3.msra.mxu0 %v2346_v39  ;;  %2586 = vmatprep.mubr.msk.f32.mxu0 %vm359_vm5, %v2953_v19  ;;  %v3162_v19 = vld [vmem:[%s3693_s12 + $0x28] sm:$0xff] }
  0x29   :  { %2607 = vmatpush3.msra.mxu1 %v307_v40  ;;  %2608 = vmatprep.mubr.msk.f32.mxu1 %vm359_vm5, %v342_v41 }
  0x2a   :  { %2587 = vmatmul.mubr.msk.f32.vlgmr.msra.gmra.mxu0 %vm359_vm5, %v2990_v32  ;;  %2609 = vmatmul.mubr.msk.f32.vlgmr.msra.gmra.mxu1 %vm359_vm5, %v340_v44 }
  0x2b   :  { %2614 = vmatprep.subr.mxu0 %v2361_v45  ;;  %2589 = vmatprep.mubr.msk.f32.mxu0 %vm359_vm5, %v2978_v28 }
  0x2c   :  { %2615 = vmatpush3.msra.mxu0 %v2361_v45  ;;  %2611 = vmatprep.mubr.msk.f32.mxu1 %vm359_vm5, %v344_v46 }
  0x2d   :  { %2616 = vmatprep.subr.mxu0 %v2360_v50  ;;  %2636 = vmatprep.subr.mxu1 %v3697_v0 }
  0x2e   :  { %2617 = vmatpush3.msra.mxu0 %v2360_v50  ;;  %2612 = vmatmul.mubr.msk.f32.gmra.mxu1 %vm359_vm5, %v338_v51  ;;  %v3699_v51 = vmov 1.0  }
  0x2f   :  { %2618 = vmatprep.subr.mxu0 %v2359_v52  ;;  %2590 = vmatmul.mubr.msk.f32.gmra.mxu0 %vm359_vm5, %v2959_v21  ;;  %v3176_v21 = vld [vmem:[%s3693_s12 + $0x18] sm:$0xff] }
  0x30   :  { %2619 = vmatpush3.msra.mxu0 %v2359_v52  ;;  %2630 = vmatprep.mubr.msk.f32.mxu0 %vm359_vm5, %v353_v54 }
  0x31   :  { %2620 = vmatprep.subr.mxu0 %v2358_v56  ;;  %2644 = vmatprep.mubr.msk.f32.mxu1 %vm2798_vm0, %v3697_v0 }
  0x32   :  { %2621 = vmatpush3.msra.mxu0 %v2358_v56 }
  0x33   :  { %2622 = vmatprep.subr.mxu0 %v2357_v57 }
  0x34   :  { %2623 = vmatpush3.msra.mxu0 %v2357_v57 }
  0x35   :  { %2624 = vmatprep.subr.mxu0 %v2356_v60 }
  0x36   :  { %2625 = vmatpush3.msra.mxu0 %v2356_v60  ;;  %v657_v60 = vld [vmem:[%s3692_s11] sm:$0xff] }
  0x37   :  { %2626 = vmatprep.subr.mxu0 %v2355_v61 }
  0x38   :  { %2627 = vmatpush3.msra.mxu0 %v2355_v61  ;;  %v1201_v61 = vld [vmem:[#allocation2 + $0x1f8] sm:$0xff] }
  0x39   :  { %2628 = vmatprep.subr.mxu0 %v2354_v2 }
  0x3a   :  { %2629 = vmatpush3.msra.mxu0 %v2354_v2 }
  0x3b   :  { %2631 = vmatmul.mubr.msk.f32.vlgmr.msra.gmra.mxu0 %vm359_vm5, %v356_v3  ;;  %2658 = vmatprep.subr.mxu0 %v3697_v0 }
  0x3c   :  { %2633 = vmatprep.mubr.msk.f32.mxu0 %vm359_vm5, %v351_v6  ;;  %2659 = vmatpush3.msra.mxu0 %v3094_v8 }
  0x3d   :  { %2660 = vmatprep.subr.mxu0 %v3697_v0 }
  0x3e   :  { %2661 = vmatpush3.msra.mxu0 %v3099_v9 }
  0x3f   :  { %2634 = vmatmul.mubr.msk.f32.gmra.mxu0 %vm359_vm5, %v358_v7  ;;  %2662 = vmatprep.subr.mxu0 %v3697_v0 }
  0x40   :  { %2690 = vmatprep.mubr.msk.f32.mxu0 %vm2798_vm0, %v3697_v0  ;;  %2663 = vmatpush3.msra.mxu0 %v3106_v10 }
  0x41   :  { %2664 = vmatprep.subr.mxu0 %v3697_v0 }
  0x42   :  { %2665 = vmatpush3.msra.mxu0 %v3113_v11 }
  0x43   :  { %2666 = vmatprep.subr.mxu0 %v3697_v0 }
  0x44   :  { %2667 = vmatpush3.msra.mxu0 %v3120_v12 }
  0x45   :  { %2668 = vmatprep.subr.mxu0 %v3697_v0 }
  0x46   :  { %2669 = vmatpush3.msra.mxu0 %v3127_v14 }
  0x47   :  { %2670 = vmatprep.subr.mxu0 %v3697_v0 }
  0x48   :  { %2671 = vmatpush3.msra.mxu0 %v3134_v15 }
  0x49   :  { %2672 = vmatprep.subr.mxu0 %v3697_v0 }
  0x4a   :  { %2673 = vmatpush3.msra.mxu0 %v3141_v16 }
  0x4b   :  { %2674 = vmatprep.subr.mxu0 %v3697_v0 }
  0x4c   :  { %2675 = vmatpush3.msra.mxu0 %v3148_v17 }
  0x4d   :  { %2676 = vmatprep.subr.mxu0 %v3697_v0 }
  0x4e   :  { %2677 = vmatpush3.msra.mxu0 %v3155_v18 }
  0x4f   :  { %2678 = vmatprep.subr.mxu0 %v3697_v0 }
  0x50   :  { %2679 = vmatpush3.msra.mxu0 %v3162_v19 }
  0x51   :  { %2680 = vmatprep.subr.mxu0 %v3697_v0 }
  0x52   :  { %2681 = vmatpush3.msra.mxu0 %v3169_v20 }
  0x53   :  { %2682 = vmatprep.subr.mxu0 %v3697_v0 }
  0x54   :  { %2683 = vmatpush3.msra.mxu0 %v3176_v21 }
  0x55   :  { %2684 = vmatprep.subr.mxu0 %v3697_v0 }
  0x56   :  { %2685 = vmatpush3.msra.mxu0 %v3183_v22 }
  0x57   :  { %2686 = vmatprep.subr.mxu0 %v3697_v0 }
  0x58   :  { %2687 = vmatpush3.msra.mxu0 %v3190_v23 }
  0x59   :  { %2688 = vmatprep.subr.mxu0 %v3697_v0 }
  0x5a   :  { %2689 = vmatpush3.msra.mxu0 %v658_v55 }
  0x5b   :  { %2728 = vmatprep.subr.mxu0 %v3697_v0 }
  0xd8   :  { %v3196_v24 = vpop.f32.mrf.mxu0 }
  0xd9   :  { %v3198_v25 = vpop.f32.mrf.mxu1 }
  0xda   :  { %v2558_v26 = vpop.f32.mrf.mxu0 }
  0xdb   :  { %v2569_v27 = vpop.f32.mrf.mxu1  ;;  %v1195_v26 = vld [vmem:[#allocation2 + $0x1c8] sm:$0xff] }
  0xdc   :  { %v1166_v27 = vld [vmem:[#allocation2 + $0xe8] sm:$0xff] }
  0xea   :  { %v2588_v28 = vpop.f32.mrf.mxu0  ;;  %v2610_v29 = vpop.f32.mrf.mxu1 }
  0xeb   :  { %v541_v45 = vadd.f32 %v2610_v29, %v2588_v28  ;;  %v1194_v28 = vld [vmem:[#allocation2 + $0x1c0] sm:$0xff] }
  0xec   :  { %v438_v30 = vpop.f32.mrf.mxu0  ;;  %v535_v32 = vpop.f32.mrf.mxu1  ;;  %v1165_v29 = vld [vmem:[#allocation2 + $0xe0] sm:$0xff] }
  0xed   :  { %v536_v47 = vadd.f32 %v535_v32, %v438_v30  ;;  %v1193_v30 = vld [vmem:[#allocation2 + $0x1b8] sm:$0xff]  ;;  %v1192_v32 = vld [vmem:[#allocation2 + $0x1b0] sm:$0xff] }
  0xee   :  { %v2613_v33 = vpop.f32.mrf.mxu1 }
  0xef   :  { %v2591_v31 = vpop.f32.mrf.mxu0 }
  0xf0   :  { %v545_v37 = vpop.f32.mrf.mxu1  ;;  %v551_v39 = vadd.f32 %v2613_v33, %v2591_v31  ;;  %v1164_v31 = vld [vmem:[#allocation2 + $0xd8] sm:$0xff]  ;;  %v1163_v33 = vld [vmem:[#allocation2 + $0xd0] sm:$0xff] }
  0xf1   :  { %v448_v34 = vpop.f32.mrf.mxu0 }
  0xf2   :  { %v546_v41 = vadd.f32 %v545_v37, %v448_v34  ;;  %v1191_v34 = vld [vmem:[#allocation2 + $0x1a8] sm:$0xff]  ;;  %v1190_v37 = vld [vmem:[#allocation2 + $0x1a0] sm:$0xff] }
  0xfb   :  { %v2632_v35 = vpop.f32.mrf.mxu0 }
  0xfc   :  { %v3206_v48 = vadd.f32 %v2632_v35, %v541_v45  ;;  %v1162_v35 = vld [vmem:[#allocation2 + $0xc8] sm:$0xff] }
  0xfd   :  { %v632_v38 = vpop.f32.mrf.mxu0  ;;  %v1187_v45 = vld [vmem:[#allocation2 + $0x188] sm:$0xff] }
  0xfe   :  { %v3210_v49 = vadd.f32 %v632_v38, %v536_v47  ;;  %v748_v53 = vmul.f32 %v3206_v48, %v3206_v48  ;;  %v1161_v38 = vld [vmem:[#allocation2 + $0xc0] sm:$0xff]  ;;  %v1158_v47 = vld [vmem:[#allocation2 + $0xa8] sm:$0xff] }
  0xff   :  { %v2635_v40 = vpop.f32.mrf.mxu0 }
 0x100   :  { %v3200_v43 = vadd.f32 %v2635_v40, %v551_v39  ;;  %v747_v54 = vmul.f32 %v3210_v49, %v3210_v49  ;;  %v1189_v39 = vld [vmem:[#allocation2 + $0x198] sm:$0xff] }
 0x101   :  { %v642_v44 = vpop.f32.mrf.mxu0  ;;  %v1160_v40 = vld [vmem:[#allocation2 + $0xb8] sm:$0xff] }
 0x102   :  { %v3202_v46 = vadd.f32 %v642_v44, %v546_v41  ;;  %2637 = vmatpush3.msra.mxu1 %v3200_v43  ;;  %v750_v50 = vmul.f32 %v3200_v43, %v3200_v43  ;;  %v1188_v41 = vld [vmem:[#allocation2 + $0x190] sm:$0xff] }
 0x103   :  { %2638 = vmatprep.subr.mxu1 %v3697_v0  ;;  %v1159_v44 = vld [vmem:[#allocation2 + $0xb0] sm:$0xff] }
 0x104   :  { %2639 = vmatpush3.msra.mxu1 %v3202_v46  ;;  %v749_v52 = vmul.f32 %v3202_v46, %v3202_v46 }
 0x105   :  { %2640 = vmatprep.subr.mxu1 %v3697_v0 }
 0x106   :  { %2641 = vmatpush3.msra.mxu1 %v3206_v48 }
 0x107   :  { %2642 = vmatprep.subr.mxu1 %v3697_v0 }
 0x108   :  { %2643 = vmatpush3.msra.mxu1 %v3210_v49 }
 0x109   :  { %2645 = vmatmul.mubr.msk.f32.vlgmr.msra.gmra.mxu1 %vm147_vm1, %v3699_v51  ;;  %2647 = vmatprep.subr.mxu1 %v3697_v0 }
 0x10a   :  { %2648 = vmatpush3.msra.mxu1 %v750_v50  ;;  %2655 = vmatprep.mubr.msk.f32.mxu1 %vm2798_vm0, %v3697_v0  ;;  %v1186_v50 = vld [vmem:[#allocation2 + $0x180] sm:$0xff] }
 0x10b   :  { %2649 = vmatprep.subr.mxu1 %v3697_v0 }
 0x10c   :  { %2650 = vmatpush3.msra.mxu1 %v749_v52  ;;  %v1157_v52 = vld [vmem:[#allocation2 + $0xa0] sm:$0xff] }
 0x10d   :  { %2651 = vmatprep.subr.mxu1 %v3697_v0 }
 0x10e   :  { %2652 = vmatpush3.msra.mxu1 %v748_v53  ;;  %v1185_v53 = vld [vmem:[#allocation2 + $0x178] sm:$0xff] }
 0x10f   :  { %2653 = vmatprep.subr.mxu1 %v3697_v0 }
 0x110   :  { %2654 = vmatpush3.msra.mxu1 %v747_v54  ;;  %v1156_v54 = vld [vmem:[#allocation2 + $0x98] sm:$0xff] }
 0x111   :  { %2656 = vmatmul.mubr.msk.f32.vlgmr.msra.gmra.mxu1 %vm147_vm1, %v3699_v51  ;;  %2693 = vmatprep.subr.mxu1 %v3697_v0 }
 0x112   :  { %2694 = vmatpush3.msra.mxu1 %v3094_v8  ;;  %2725 = vmatprep.mubr.msk.f32.mxu1 %vm2798_vm0, %v3697_v0 }
 0x113   :  { %2695 = vmatprep.subr.mxu1 %v3697_v0 }
 0x114   :  { %2696 = vmatpush3.msra.mxu1 %v3099_v9 }
 0x115   :  { %2697 = vmatprep.subr.mxu1 %v3697_v0 }
 0x116   :  { %2698 = vmatpush3.msra.mxu1 %v3106_v10 }
 0x117   :  { %2699 = vmatprep.subr.mxu1 %v3697_v0 }
 0x118   :  { %2700 = vmatpush3.msra.mxu1 %v3113_v11  ;;  %v655_v11 = vld [vmem:[%s3688_s7] sm:$0x1] }
 0x119   :  { %2701 = vmatprep.subr.mxu1 %v3697_v0 }
 0x11a   :  { %2702 = vmatpush3.msra.mxu1 %v3120_v12 }
 0x11b   :  { %2703 = vmatprep.subr.mxu1 %v3697_v0 }
 0x11c   :  { %2704 = vmatpush3.msra.mxu1 %v3127_v14 }
 0x11d   :  { %2705 = vmatprep.subr.mxu1 %v3697_v0 }
 0x11e   :  { %2706 = vmatpush3.msra.mxu1 %v3134_v15  ;;  %v1200_v15 = vld [vmem:[#allocation2 + $0x1f0] sm:$0xff] }
 0x11f   :  { %2707 = vmatprep.subr.mxu1 %v3697_v0 }
 0x120   :  { %2708 = vmatpush3.msra.mxu1 %v3141_v16  ;;  %v656_v16 = vld [vmem:[%s3689_s8] sm:$0x1] }
 0x121   :  { %2709 = vmatprep.subr.mxu1 %v3697_v0 }
 0x122   :  { %2710 = vmatpush3.msra.mxu1 %v3148_v17  ;;  %v1199_v17 = vld [vmem:[#allocation2 + $0x1e8] sm:$0xff] }
 0x123   :  { %2711 = vmatprep.subr.mxu1 %v3697_v0 }
 0x124   :  { %2712 = vmatpush3.msra.mxu1 %v3155_v18 }
 0x125   :  { %2713 = vmatprep.subr.mxu1 %v3697_v0 }
 0x126   :  { %2714 = vmatpush3.msra.mxu1 %v3162_v19  ;;  %v1198_v19 = vld [vmem:[#allocation2 + $0x1e0] sm:$0xff] }
 0x127   :  { %2715 = vmatprep.subr.mxu1 %v3697_v0 }
 0x128   :  { %2716 = vmatpush3.msra.mxu1 %v3169_v20  ;;  %v1197_v20 = vld [vmem:[#allocation2 + $0x1d8] sm:$0xff] }
 0x129   :  { %2717 = vmatprep.subr.mxu1 %v3697_v0 }
 0x12a   :  { %2718 = vmatpush3.msra.mxu1 %v3176_v21 }
 0x12b   :  { %2719 = vmatprep.subr.mxu1 %v3697_v0 }
 0x12c   :  { %2720 = vmatpush3.msra.mxu1 %v3183_v22  ;;  %v1196_v22 = vld [vmem:[#allocation2 + $0x1d0] sm:$0xff] }
 0x12d   :  { %2721 = vmatprep.subr.mxu1 %v3697_v0 }
 0x12e   :  { %2722 = vmatpush3.msra.mxu1 %v3190_v23  ;;  %v1167_v23 = vld [vmem:[#allocation2 + $0xf0] sm:$0xff] }
 0x12f   :  { %2723 = vmatprep.subr.mxu1 %v3697_v0 }
 0x130   :  { %2724 = vmatpush3.msra.mxu1 %v658_v55  ;;  %v1184_v55 = vld [vmem:[#allocation2 + $0x170] sm:$0xff] }
 0x131   :  { %2733 = vmatprep.subr.mxu1 %v3697_v0 }
 0x1c9   :  { %v743_v56 = vpop.f32.mrf.mxu1 }
 0x1ca   :  { %2691 = vmatmul.mubr.f32.vlgmr.msra.gmra.mxu0 %v743_v56  ;;  %v1155_v56 = vld [vmem:[#allocation2 + $0x90] sm:$0xff] }
 0x1cb   :  { %v2646_v57 = vpop.f32.mrf.mxu1  ;;  %2730 = vmatprep.mubr.msk.f32.mxu0 %vm2798_vm0, %v3697_v0  ;;  %2729 = vmatpush3.msra.mxu0 %v657_v60 }
 0x1cc   :  { %1259 = vmatprep.subr.mxu0 %v1201_v61  ;;  %v1183_v57 = vld [vmem:[#allocation2 + $0x168] sm:$0xff]  ;;  %v1181_v61 = vld [vmem:[#allocation2 + $0x158] sm:$0xff] }
 0x1d1   :  { %v817_v58 = vpop.f32.mrf.mxu1 }
 0x1d2   :  { %2726 = vmatmul.mubr.f32.vlgmr.msra.gmra.mxu1 %v817_v58  ;;  %v1154_v58 = vld [vmem:[#allocation2 + $0x88] sm:$0xff] }
 0x1d3   :  { %v2657_v59 = vpop.f32.mrf.mxu1  ;;  %2735 = vmatprep.mubr.msk.f32.mxu1 %vm2798_vm0, %v3697_v0  ;;  %2734 = vmatpush3.msra.mxu1 %v657_v60  ;;  %v1153_v60 = vld [vmem:[#allocation2 + $0x80] sm:$0xff] }
 0x1d4   :  { %1348 = vmatprep.subr.mxu1 %v1168_v63  ;;  %v1182_v59 = vld [vmem:[#allocation2 + $0x160] sm:$0xff]  ;;  %v1180_v63 = vld [vmem:[#allocation2 + $0x150] sm:$0xff] }
 0x28a   :  { %v887_v1 = vpop.f32.mrf.mxu0 }
 0x28b   :  { %v891_v3 = vmul.f32 0.001953125, %v887_v1  ;;  %v1179_v1 = vld [vmem:[#allocation2 + $0x148] sm:$0xff] }
 0x28c   :  { %v2692_v2 = vpop.f32.mrf.mxu0 }
 0x28d   :  { %v963_v6 = vmul.f32 %v891_v3, %v891_v3  ;;  %v1152_v2 = vld [vmem:[#allocation2 + $0x78] sm:$0xff] }
 0x292   :  { %v958_v5 = vpop.f32.mrf.mxu1 }
 0x293   :  { %v962_v7 = vmul.f32 0.001953125, %v958_v5  ;;  %v1151_v5 = vld [vmem:[#allocation2 + $0x70] sm:$0xff] }
 0x294   :  { %v2727_v8 = vpop.f32.mrf.mxu1 }
 0x295   :  { %v964_v9 = vsub.f32 %v962_v7, %v963_v6  ;;  %v1177_v6 = vld [vmem:[#allocation2 + $0x138] sm:$0xff]  ;;  %v1150_v7 = vld [vmem:[#allocation2 + $0x68] sm:$0xff]  ;;  %v1176_v8 = vld [vmem:[#allocation2 + $0x130] sm:$0xff] }
 0x297   :  { %v965_v10 = vadd.f32 1e-05, %v964_v9  ;;  %v1149_v9 = vld [vmem:[#allocation2 + $0x60] sm:$0xff] }
 0x299   :  { %2746 = vrsqrt.f32 %v965_v10  ;;  %v1175_v10 = vld [vmem:[#allocation2 + $0x128] sm:$0xff] }
 0x2a6   :  { %v2747_v12 = vpop.eup %2746 }
 0x2a7   :  { %v967_v14 = vmul.f32 %v2747_v12, %v655_v11  ;;  %v1148_v11 = vld [vmem:[#allocation2 + $0x58] sm:$0xff]  ;;  %v1174_v12 = vld [vmem:[#allocation2 + $0x120] sm:$0xff] }
 0x2a9   :  { %2731 = vmatmul.mubr.msk.f32.vlgmr.msra.gmra.mxu0 %vm970_vm9, %v967_v14  ;;  %v968_v18 = vmul.f32 %v967_v14, %v891_v3  ;;  %v1178_v3 = vld [vmem:[#allocation2 + $0x140] sm:$0xff]  ;;  %v1147_v14 = vld [vmem:[#allocation2 + $0x50] sm:$0xff] }
 0x2aa   :  { %1260 = vmatpush1.msra.mxu0 %v1200_v15  ;;  %1323 = vmatprep.mubr.f32.mxu0 %v3697_v0  ;;  %v1173_v15 = vld [vmem:[#allocation2 + $0x118] sm:$0xff] }
 0x2ab   :  { %v969_v21 = vsub.f32 %v656_v16, %v968_v18  ;;  %1261 = vmatprep.subr.mxu0 %v1199_v17  ;;  %v1146_v16 = vld [vmem:[#allocation2 + $0x48] sm:$0xff]  ;;  %v1172_v17 = vld [vmem:[#allocation2 + $0x110] sm:$0xff]  ;;  %v1145_v18 = vld [vmem:[#allocation2 + $0x40] sm:$0xff] }
 0x2ac   :  { %1262 = vmatpush1.msra.mxu0 %v1198_v19  ;;  %v1171_v19 = vld [vmem:[#allocation2 + $0x108] sm:$0xff] }
 0x2ad   :  { %2736 = vmatmul.mubr.msk.f32.vlgmr.msra.gmra.mxu1 %vm970_vm9, %v969_v21  ;;  %1263 = vmatprep.subr.mxu0 %v1197_v20  ;;  %v1144_v20 = vld [vmem:[#allocation2 + $0x38] sm:$0xff]  ;;  %v1170_v21 = vld [vmem:[#allocation2 + $0x100] sm:$0xff] }
 0x2ae   :  { %1264 = vmatpush1.msra.mxu0 %v1196_v22  ;;  %1349 = vmatpush1.msra.mxu1 %v1167_v23  ;;  %v1143_v22 = vld [vmem:[#allocation2 + $0x30] sm:$0xff]  ;;  %v1142_v23 = vld [vmem:[#allocation2 + $0x28] sm:$0xff] }
 0x2af   :  { %1265 = vmatprep.subr.mxu0 %v1195_v26  ;;  %1350 = vmatprep.subr.mxu1 %v1166_v27  ;;  %v1234_v26 = vld [vmem:[#allocation2 + $0x2f8] sm:$0xff]  ;;  %v1141_v27 = vld [vmem:[#allocation2 + $0x20] sm:$0xff] }
 0x2b0   :  { %1266 = vmatpush1.msra.mxu0 %v1194_v28  ;;  %1351 = vmatpush1.msra.mxu1 %v1165_v29  ;;  %v1140_v28 = vld [vmem:[#allocation2 + $0x18] sm:$0xff]  ;;  %v1139_v29 = vld [vmem:[#allocation2 + $0x10] sm:$0xff] }
 0x2b1   :  { %1267 = vmatprep.subr.mxu0 %v1193_v30  ;;  %1352 = vmatprep.subr.mxu1 %v1164_v31  ;;  %v1138_v30 = vld [vmem:[#allocation2 + $0x8] sm:$0xff]  ;;  %v1137_v31 = vld [vmem:[#allocation2] sm:$0xff] }
 0x2b2   :  { %1268 = vmatpush1.msra.mxu0 %v1192_v32  ;;  %1353 = vmatpush1.msra.mxu1 %v1163_v33  ;;  %v3291_v32 = vld [vmem:[%s3694_s13 + $0x18] sm:$0xff]  ;;  %v3295_v33 = vsub.s32 0, %v2933_v13 }
 0x2b3   :  { %1269 = vmatprep.subr.mxu0 %v1191_v34  ;;  %1354 = vmatprep.subr.mxu1 %v1162_v35  ;;  %3720 = vst [vmem:[#allocation8_spill] sm:$0xff] %v3291_v32 }
 0x2b4   :  { %1270 = vmatpush1.msra.mxu0 %v1190_v37  ;;  %1355 = vmatpush1.msra.mxu1 %v1161_v38 }
 0x2b5   :  { %1271 = vmatprep.subr.mxu0 %v1189_v39  ;;  %1356 = vmatprep.subr.mxu1 %v1160_v40 }
 0x2b6   :  { %1272 = vmatpush1.msra.mxu0 %v1188_v41  ;;  %1357 = vmatpush1.msra.mxu1 %v1159_v44 }
 0x2b7   :  { %1273 = vmatprep.subr.mxu0 %v1187_v45  ;;  %1358 = vmatprep.subr.mxu1 %v1158_v47 }
 0x2b8   :  { %1274 = vmatpush1.msra.mxu0 %v1186_v50  ;;  %1359 = vmatpush1.msra.mxu1 %v1157_v52 }
 0x2b9   :  { %1275 = vmatprep.subr.mxu0 %v1185_v53  ;;  %1360 = vmatprep.subr.mxu1 %v1156_v54 }
 0x2ba   :  { %1276 = vmatpush1.msra.mxu0 %v1184_v55  ;;  %1361 = vmatpush1.msra.mxu1 %v1155_v56 }
 0x2bb   :  { %1277 = vmatprep.subr.mxu0 %v1183_v57  ;;  %1362 = vmatprep.subr.mxu1 %v1154_v58  ;;  %v1233_v57 = vld [vmem:[#allocation2 + $0x2f0] sm:$0xff] }
 0x2bc   :  { %1278 = vmatpush1.msra.mxu0 %v1182_v59  ;;  %1363 = vmatpush1.msra.mxu1 %v1153_v60  ;;  %v1230_v60 = vld [vmem:[#allocation2 + $0x2d8] sm:$0xff] }
 0x2bd   :  { %1279 = vmatprep.subr.mxu0 %v1181_v61  ;;  %1412 = vmatprep.mubr.f32.mxu1 %v3697_v0  ;;  %v1229_v61 = vld [vmem:[#allocation2 + $0x2d0] sm:$0xff] }
 0x2be   :  { %1280 = vmatpush1.msra.mxu0 %v1180_v63  ;;  %1364 = vmatprep.subr.mxu1 %v1152_v2  ;;  %v1228_v2 = vld [vmem:[#allocation2 + $0x2c8] sm:$0xff] }
 0x2bf   :  { %1281 = vmatprep.subr.mxu0 %v1179_v1  ;;  %1365 = vmatpush1.msra.mxu1 %v1151_v5 }
 0x2c0   :  { %1282 = vmatpush1.msra.mxu0 %v1178_v3  ;;  %1366 = vmatprep.subr.mxu1 %v1150_v7  ;;  %v1227_v3 = vld [vmem:[#allocation2 + $0x2c0] sm:$0xff]  ;;  %v1226_v7 = vld [vmem:[#allocation2 + $0x2b8] sm:$0xff] }
 0x2c1   :  { %1283 = vmatprep.subr.mxu0 %v1177_v6  ;;  %1367 = vmatpush1.msra.mxu1 %v1149_v9 }
 0x2c2   :  { %1284 = vmatpush1.msra.mxu0 %v1176_v8  ;;  %1368 = vmatprep.subr.mxu1 %v1148_v11  ;;  %v1225_v8 = vld [vmem:[#allocation2 + $0x2b0] sm:$0xff] }
 0x2c3   :  { %1285 = vmatprep.subr.mxu0 %v1175_v10  ;;  %1369 = vmatpush1.msra.mxu1 %v1147_v14  ;;  %v1223_v10 = vld [vmem:[#allocation2 + $0x2a0] sm:$0xff]  ;;  %v1221_v14 = vld [vmem:[#allocation2 + $0x290] sm:$0xff] }
 0x2c4   :  { %1286 = vmatpush1.msra.mxu0 %v1174_v12  ;;  %1370 = vmatprep.subr.mxu1 %v1146_v16  ;;  %v1222_v12 = vld [vmem:[#allocation2 + $0x298] sm:$0xff]  ;;  %v1220_v16 = vld [vmem:[#allocation2 + $0x288] sm:$0xff] }
 0x2c5   :  { %1287 = vmatprep.subr.mxu0 %v1173_v15  ;;  %1371 = vmatpush1.msra.mxu1 %v1145_v18  ;;  %v3335_v18 = vld [vmem:[%s3694_s13 + $0x10] sm:$0xff] }
 0x2c6   :  { %1288 = vmatpush1.msra.mxu0 %v1172_v17  ;;  %1372 = vmatprep.subr.mxu1 %v1144_v20  ;;  %v1219_v17 = vld [vmem:[#allocation2 + $0x280] sm:$0xff]  ;;  %3721 = vst [vmem:[#allocation9_spill] sm:$0xff] %v3335_v18  ;;  %v3340_v20 = vld [vmem:[%s3694_s13 + $0x8] sm:$0xff] }
 0x2c7   :  { %1289 = vmatprep.subr.mxu0 %v1171_v19  ;;  %1373 = vmatpush1.msra.mxu1 %v1143_v22  ;;  %v1218_v19 = vld [vmem:[#allocation2 + $0x278] sm:$0xff]  ;;  %3722 = vst [vmem:[#allocation10_spill] sm:$0xff] %v3340_v20  ;;  %v3347_v22 = vld [vmem:[%s3694_s13] sm:$0xff] }
 0x2c8   :  { %1290 = vmatpush1.msra.mxu0 %v1170_v21  ;;  %1374 = vmatprep.subr.mxu1 %v1142_v23  ;;  %v1216_v21 = vld [vmem:[#allocation2 + $0x268] sm:$0xff]  ;;  %3723 = vst [vmem:[#allocation11_spill] sm:$0xff] %v3347_v22 }
 0x2c9   :  { %1437 = vmatprep.subr.mxu0 %v1234_v26  ;;  %1375 = vmatpush1.msra.mxu1 %v1141_v27  ;;  %v1215_v26 = vld [vmem:[#allocation2 + $0x260] sm:$0xff] }
 0x2ca   :  { %1376 = vmatprep.subr.mxu1 %v1140_v28  ;;  %v2344_v27 = vld [vmem:[%s3684_s3] ss:$0 sm:$0xff]  ;;  %v1214_v28 = vld [vmem:[#allocation2 + $0x258] sm:$0xff] }
 0x2cb   :  { %1377 = vmatpush1.msra.mxu1 %v1139_v29  ;;  %v1213_v29 = vld [vmem:[#allocation2 + $0x250] sm:$0xff] }
 0x2cc   :  { %1378 = vmatprep.subr.mxu1 %v1138_v30  ;;  %v1212_v30 = vld [vmem:[#allocation2 + $0x248] sm:$0xff] }
 0x2cd   :  { %1379 = vmatpush1.msra.mxu1 %v1137_v31  ;;  %v232_v31 = vmul.f32 %v2344_v27, %v3196_v24 }
 0x2ce   :  { %1570 = vmatprep.subr.mxu1 %v3291_v32 }
 0x369   :  { %v1040_v34 = vpop.f32.mrf.mxu0 }
 0x36a   :  { %v1120_v35 = vrot.slane %v1040_v34, %v3295_v33  ;;  %v1211_v34 = vld [vmem:[#allocation2 + $0x240] sm:$0xff] }
 0x36b   :  { %v2732_v37 = vpop.f32.mrf.mxu0 }
 0x36c   :  { %v1121_v38 = vmul.f32 %v1120_v35, %v3210_v49  ;;  %v1124_v40 = vmul.f32 %v1120_v35, %v3200_v43  ;;  %v1122_v44 = vmul.f32 %v1120_v35, %v3206_v48  ;;  %v1123_v45 = vmul.f32 %v1120_v35, %v3202_v46  ;;  %v1232_v49 = vld [vmem:[#allocation2 + $0x2e8] sm:$0xff]  ;;  %v1231_v43 = vld [vmem:[#allocation2 + $0x2e0] sm:$0xff]  ;;  %v1210_v35 = vld [vmem:[#allocation2 + $0x238] sm:$0xff] }
 0x36d   :  { %v1113_v39 = vpop.f32.mrf.mxu1  ;;  %v1209_v37 = vld [vmem:[#allocation2 + $0x230] sm:$0xff] }
 0x36e   :  { %v1128_v41 = vrot.slane %v1113_v39, %v3295_v33  ;;  %v300_v39 = vadd.f32 %v3198_v25, %v232_v31 }
 0x36f   :  { %v2737_v47 = vpop.f32.mrf.mxu1 }
 0x370   :  { %v1132_v50 = vadd.f32 %v1128_v41, %v1124_v40  ;;  %v1129_v52 = vadd.f32 %v1128_v41, %v1121_v38  ;;  %v1130_v53 = vadd.f32 %v1128_v41, %v1122_v44  ;;  %v1131_v54 = vadd.f32 %v1128_v41, %v1123_v45  ;;  %v1208_v38 = vld [vmem:[#allocation2 + $0x228] sm:$0xff]  ;;  %v1207_v40 = vld [vmem:[#allocation2 + $0x220] sm:$0xff]  ;;  %v1206_v41 = vld [vmem:[#allocation2 + $0x218] sm:$0xff] }
 0x371   :  { %v1204_v47 = vld [vmem:[#allocation2 + $0x208] sm:$0xff] }
 0x372   :  { %v3303_v55 = vmax.f32 %v1132_v50, 0.0  ;;  %v3305_v56 = vmax.f32 %v1129_v52, 0.0  ;;  %v3309_v59 = vmax.f32 %v1130_v53, 0.0  ;;  %v3312_v48 = vmax.f32 %v1131_v54, 0.0  ;;  %v1203_v50 = vld [vmem:[#allocation2 + $0x200] sm:$0xff] }
 0x374   :  { %v1235_v58 = vrot.slane %v3305_v56, 7  ;;  %1324 = vmatmul.mubr.f32.vlgmr.msra.gmra.mxu0 %v3305_v56  ;;  %v1238_v46 = vrot.slane %v3303_v55, 7  ;;  %v1237_v5 = vrot.slane %v3312_v48, 7  ;;  %v1236_v6 = vrot.slane %v3309_v59, 7 }
 0x375   :  { %1438 = vmatpush1.msra.mxu0 %v1233_v57  ;;  %1329 = vmatprep.mubr.f32.mxu0 %v3697_v0  ;;  %v1248_v44 = vrot.slane %v3309_v59, 1  ;;  %v1249_v45 = vrot.slane %v3312_v48, 1  ;;  %v1247_v25 = vrot.slane %v3305_v56, 1  ;;  %v1250_v56 = vrot.slane %v3303_v55, 1 }
 0x376   :  { %1439 = vmatprep.subr.mxu0 %v1232_v49  ;;  %v1242_v63 = vsel %vm337_vm3, %v1238_v46, %v1235_v58  ;;  %v1241_v9 = vsel %vm337_vm3, %v1235_v58, %v1236_v6  ;;  %v1240_v11 = vsel %vm337_vm3, %v1236_v6, %v1237_v5  ;;  %v1239_v23 = vsel %vm337_vm3, %v1237_v5, %v1238_v46  ;;  %v3417_v46 = vld [vmem:[%s3695_s14 + $0x68] sm:$0xff]  ;;  %v3471_v6 = vld [vmem:[%s3695_s14 + $0xc0] sm:$0xff] }
 0x377   :  { %1440 = vmatpush1.msra.mxu0 %v1231_v43  ;;  %v1243_v1 = vmul.f32 %v3000_v36, %v1242_v63  ;;  %v1224_v36 = vld [vmem:[#allocation2 + $0x2a8] sm:$0xff]  ;;  %v1245_v15 = vmul.f32 %v3013_v42, %v1240_v11  ;;  %v1217_v42 = vld [vmem:[#allocation2 + $0x270] sm:$0xff]  ;;  %v1253_v52 = vsel %vm350_vm6, %v1247_v25, %v1248_v44  ;;  %v1252_v53 = vsel %vm350_vm6, %v1248_v44, %v1249_v45  ;;  %v3441_v63 = vld [vmem:[%s3695_s14 + $0x58] sm:$0xff] }
 0x378   :  { %1441 = vmatprep.subr.mxu0 %v1230_v60  ;;  %1330 = vmatmul.mubr.f32.gmra.mxu0 %v3309_v59  ;;  %v1256_v54 = vmul.f32 %v3068_v62, %v1252_v53  ;;  %v1251_v57 = vsel %vm350_vm6, %v1249_v45, %v1250_v56  ;;  %v1254_v49 = vsel %vm350_vm6, %v1250_v56, %v1247_v25  ;;  %v3389_v62 = vld [vmem:[%s3695_s14 + $0xf8] sm:$0xff]  ;;  %v3399_v43 = vld [vmem:[%s3695_s14 + $0xf0] sm:$0xff]  ;;  %v3411_v59 = vld [vmem:[%s3695_s14 + $0xe8] sm:$0xff] }
 0x379   :  { %1442 = vmatpush1.msra.mxu0 %v1229_v61  ;;  %1413 = vmatmul.mubr.f32.vlgmr.msra.gmra.mxu1 %v1243_v1  ;;  %v1258_v58 = vmul.f32 %v3078_v4, %v1254_v49  ;;  %v3405_v4 = vld [vmem:[%s3695_s14 + $0x70] sm:$0xff]  ;;  %v3429_v60 = vld [vmem:[%s3695_s14 + $0x60] sm:$0xff]  ;;  %v3435_v61 = vld [vmem:[%s3695_s14 + $0xd8] sm:$0xff] }
 0x37a   :  { %1443 = vmatprep.subr.mxu0 %v1228_v2  ;;  %1335 = vmatprep.mubr.f32.mxu0 %v3697_v0  ;;  %v3447_v1 = vld [vmem:[%s3695_s14 + $0xd0] sm:$0xff]  ;;  %v3465_v5 = vld [vmem:[%s3695_s14 + $0x48] sm:$0xff] }
 0x37b   :  { %1444 = vmatpush1.msra.mxu0 %v1227_v3  ;;  %1418 = vmatprep.mubr.f32.mxu1 %v3697_v0  ;;  %v3453_v2 = vld [vmem:[%s3695_s14 + $0x50] sm:$0xff]  ;;  %v3459_v3 = vld [vmem:[%s3695_s14 + $0xc8] sm:$0xff] }
 0x37c   :  { %1445 = vmatprep.subr.mxu0 %v1226_v7  ;;  %1336 = vmatmul.mubr.f32.gmra.mxu0 %v3312_v48  ;;  %v3423_v48 = vld [vmem:[%s3695_s14 + $0xe0] sm:$0xff]  ;;  %v3507_v11 = vld [vmem:[%s3695_s14 + $0xa8] sm:$0xff] }
 0x37d   :  { %1446 = vmatpush1.msra.mxu0 %v1225_v8  ;;  %1419 = vmatmul.mubr.f32.gmra.mxu1 %v1241_v9  ;;  %v3477_v7 = vld [vmem:[%s3695_s14 + $0x40] sm:$0xff]  ;;  %v3483_v8 = vld [vmem:[%s3695_s14 + $0xb8] sm:$0xff]  ;;  %v3495_v9 = vld [vmem:[%s3695_s14 + $0xb0] sm:$0xff]  ;;  %3727 = vst [vmem:[#allocation15_spill] sm:$0xff] %v3507_v11 }
 0x37e   :  { %1447 = vmatprep.subr.mxu0 %v1224_v36  ;;  %1341 = vmatprep.mubr.f32.mxu0 %v3697_v0  ;;  %v3489_v36 = vld [vmem:[%s3695_s14 + $0x38] sm:$0xff]  ;;  %3725 = vst [vmem:[#allocation13_spill] sm:$0xff] %v3495_v9 }
 0x37f   :  { %1448 = vmatpush1.msra.mxu0 %v1223_v10  ;;  %1424 = vmatprep.mubr.f32.mxu1 %v3697_v0  ;;  %3724 = vst [vmem:[#allocation12_spill] sm:$0xff] %v3489_v36  ;;  %v3501_v10 = vld [vmem:[%s3695_s14 + $0x30] sm:$0xff] }
 0x380   :  { %1449 = vmatprep.subr.mxu0 %v1222_v12  ;;  %1342 = vmatmul.mubr.f32.gmra.mxu0 %v3303_v55  ;;  %v3394_v55 = vld [vmem:[%s3695_s14 + $0x78] sm:$0xff]  ;;  %3726 = vst [vmem:[#allocation14_spill] sm:$0xff] %v3501_v10  ;;  %v3513_v12 = vld [vmem:[%s3695_s14 + $0x28] sm:$0xff] }
 0x381   :  { %1450 = vmatpush1.msra.mxu0 %v1221_v14  ;;  %1425 = vmatmul.mubr.f32.gmra.mxu1 %v1245_v15  ;;  %3728 = vst [vmem:[#allocation16_spill] sm:$0xff] %v3513_v12  ;;  %v3519_v14 = vld [vmem:[%s3695_s14 + $0xa0] sm:$0xff] }
 0x382   :  { %1451 = vmatprep.subr.mxu0 %v1220_v16  ;;  %1430 = vmatprep.mubr.f32.mxu1 %v3697_v0  ;;  %3729 = vst [vmem:[#allocation17_spill] sm:$0xff] %v3519_v14  ;;  %v3525_v15 = vld [vmem:[%s3695_s14 + $0x20] sm:$0xff]  ;;  %v3531_v16 = vld [vmem:[%s3695_s14 + $0x98] sm:$0xff] }
 0x383   :  { %1452 = vmatpush1.msra.mxu0 %v1219_v17  ;;  %1571 = vmatpush1.msra.mxu1 %v3335_v18  ;;  %3730 = vst [vmem:[#allocation18_spill] sm:$0xff] %v3525_v15  ;;  %3731 = vst [vmem:[#allocation19_spill] sm:$0xff] %v3531_v16  ;;  %v3537_v17 = vld [vmem:[%s3695_s14 + $0x18] sm:$0xff] }
 0x384   :  { %1453 = vmatprep.subr.mxu0 %v1218_v19  ;;  %1572 = vmatprep.subr.mxu1 %v3340_v20  ;;  %3732 = vst [vmem:[#allocation20_spill] sm:$0xff] %v3537_v17  ;;  %v3543_v19 = vld [vmem:[%s3695_s14 + $0x90] sm:$0xff] }
 0x385   :  { %1454 = vmatpush1.msra.mxu0 %v1217_v42  ;;  %1431 = vmatmul.mubr.f32.gmra.mxu1 %v1239_v23  ;;  %3733 = vst [vmem:[#allocation21_spill] sm:$0xff] %v3543_v19  ;;  %v3549_v42 = vld [vmem:[%s3695_s14 + $0x10] sm:$0xff] }
 0x386   :  { %1455 = vmatprep.subr.mxu0 %v1216_v21  ;;  %1573 = vmatpush1.msra.mxu1 %v3347_v22  ;;  %3734 = vst [vmem:[#allocation22_spill] sm:$0xff] %v3549_v42 }
 0x387   :  { %1456 = vmatpush1.msra.mxu0 %v1215_v26  ;;  %1606 = vmatprep.mubr.f32.mxu1 %v3697_v0 }
 0x388   :  { %1457 = vmatprep.subr.mxu0 %v1214_v28  ;;  %1644 = vmatprep.subr.mxu1 %v3291_v32 }
 0x389   :  { %1458 = vmatpush1.msra.mxu0 %v1213_v29  ;;  %2378 = vmatmul.mubr.msk.f32.vlgmr.msra.gmra.mxu1 %vm1538_vm10, %v3196_v24  ;;  %v1205_v24 = vld [vmem:[#allocation2 + $0x210] sm:$0xff] }
 0x38a   :  { %1459 = vmatprep.subr.mxu0 %v1212_v30  ;;  %1645 = vmatpush1.msra.mxu1 %v3335_v18 }
 0x38b   :  { %1460 = vmatpush1.msra.mxu0 %v1211_v34  ;;  %1646 = vmatprep.subr.mxu1 %v3340_v20 }
 0x38c   :  { %1461 = vmatprep.subr.mxu0 %v1210_v35  ;;  %1647 = vmatpush1.msra.mxu1 %v3347_v22 }
 0x38d   :  { %1462 = vmatpush1.msra.mxu0 %v1209_v37  ;;  %1680 = vmatprep.mubr.f32.mxu1 %v3697_v0 }
 0x38e   :  { %1463 = vmatprep.subr.mxu0 %v1208_v38  ;;  %2379 = vmatmul.mubr.msk.f32.vlgmr.msra.gmra.mxu1 %vm1538_vm10, %v300_v39 }
 0x38f   :  { %1464 = vmatpush1.msra.mxu0 %v1207_v40  ;;  %1501 = vmatprep.mubr.f32.mxu0 %v3697_v0 }
 0x390   :  { %1465 = vmatprep.subr.mxu0 %v1206_v41  ;;  %1891 = vmatprep.mubr.f32.mxu1 %v3697_v0 }
 0x391   :  { %1466 = vmatpush1.msra.mxu0 %v1205_v24  ;;  %v2800_v24 = vmov 1966171168  }
 0x392   :  { %1467 = vmatprep.subr.mxu0 %v1204_v47  ;;  %v1691_v44 = vunpack.c.l.s4 %v2800_v24 }
 0x393   :  { %1468 = vmatpush1.msra.mxu0 %v1203_v50 }
 0x394   :  { %1502 = vmatmul.mubr.f32.vlgmr.msra.gmra.mxu0 %v1253_v52  ;;  %2478 = vmatprep.subr.mxu0 %v3389_v62  ;;  %v1692_v25 = vunpack.c.0.s8 %v1691_v44 }
 0x395   :  { %1507 = vmatprep.mubr.f32.mxu0 %v3697_v0  ;;  %2479 = vmatpush3.msra.mxu0 %v3394_v55 }
 0x396   :  { %2480 = vmatprep.subr.mxu0 %v3399_v43 }
 0x397   :  { %2481 = vmatpush3.msra.mxu0 %v3405_v4 }
 0x398   :  { %1508 = vmatmul.mubr.f32.gmra.mxu0 %v1256_v54  ;;  %2482 = vmatprep.subr.mxu0 %v3411_v59  ;;  %v1695_v54 = vsub.s32 %v1692_v25, %v2933_v13 }
 0x399   :  { %1513 = vmatprep.mubr.f32.mxu0 %v3697_v0  ;;  %2483 = vmatpush3.msra.mxu0 %v3417_v46 }
 0x39a   :  { %2484 = vmatprep.subr.mxu0 %v3423_v48 }
 0x39b   :  { %2485 = vmatpush3.msra.mxu0 %v3429_v60 }
 0x39c   :  { %1514 = vmatmul.mubr.f32.gmra.mxu0 %v1251_v57  ;;  %2486 = vmatprep.subr.mxu0 %v3435_v61 }
 0x39d   :  { %1519 = vmatprep.mubr.f32.mxu0 %v3697_v0  ;;  %2487 = vmatpush3.msra.mxu0 %v3441_v63 }
 0x39e   :  { %2488 = vmatprep.subr.mxu0 %v3447_v1 }
 0x39f   :  { %2489 = vmatpush3.msra.mxu0 %v3453_v2 }
 0x3a0   :  { %1520 = vmatmul.mubr.f32.gmra.mxu0 %v1258_v58  ;;  %2490 = vmatprep.subr.mxu0 %v3459_v3 }
 0x3a1   :  { %2491 = vmatpush3.msra.mxu0 %v3465_v5 }
 0x3a2   :  { %2492 = vmatprep.subr.mxu0 %v3471_v6 }
 0x3a3   :  { %2493 = vmatpush3.msra.mxu0 %v3477_v7 }
 0x3a4   :  { %2494 = vmatprep.subr.mxu0 %v3483_v8 }
 0x3a5   :  { %2495 = vmatpush3.msra.mxu0 %v3489_v36 }
 0x3a6   :  { %2496 = vmatprep.subr.mxu0 %v3495_v9 }
 0x3a7   :  { %2497 = vmatpush3.msra.mxu0 %v3501_v10 }
 0x3a8   :  { %2498 = vmatprep.subr.mxu0 %v3507_v11 }
 0x3a9   :  { %2499 = vmatpush3.msra.mxu0 %v3513_v12 }
 0x3aa   :  { %2500 = vmatprep.subr.mxu0 %v3519_v14 }
 0x3ab   :  { %2501 = vmatpush3.msra.mxu0 %v3525_v15 }
 0x3ac   :  { %2502 = vmatprep.subr.mxu0 %v3531_v16 }
 0x3ad   :  { %2503 = vmatpush3.msra.mxu0 %v3537_v17 }
 0x3ae   :  { %2504 = vmatprep.subr.mxu0 %v3543_v19 }
 0x3af   :  { %2505 = vmatpush3.msra.mxu0 %v3549_v42 }
 0x434   :  { %v1325_v21 = vpop.f32.mrf.mxu0 }
 0x436   :  { %v1327_v26 = vpop.f32.mrf.mxu0 }
 0x438   :  { %v1331_v29 = vpop.f32.mrf.mxu0 }
 0x439   :  { %v1414_v23 = vpop.f32.mrf.mxu1 }
 0x43a   :  { %v1333_v34 = vpop.f32.mrf.mxu0  ;;  %v1415_v12 = vadd.f32 %v1414_v23, %v1325_v21 }
 0x43b   :  { %v1416_v27 = vpop.f32.mrf.mxu1 }
 0x43c   :  { %v1337_v38 = vpop.f32.mrf.mxu0 }
 0x43d   :  { %v1420_v28 = vpop.f32.mrf.mxu1 }
 0x43e   :  { %v1339_v41 = vpop.f32.mrf.mxu0 }
 0x43f   :  { %v1422_v30 = vpop.f32.mrf.mxu1 }
 0x440   :  { %v1343_v47 = vpop.f32.mrf.mxu0  ;;  %v1423_v16 = vadd.f32 %v1422_v30, %v1333_v34 }
 0x441   :  { %v1426_v31 = vpop.f32.mrf.mxu1 }
 0x442   :  { %v1345_v52 = vpop.f32.mrf.mxu0  ;;  %v1427_v15 = vadd.f32 %v1426_v31, %v1337_v38 }
 0x443   :  { %v1428_v35 = vpop.f32.mrf.mxu1 }
 0x444   :  { %v1429_v17 = vadd.f32 %v1428_v35, %v1339_v41 }
 0x445   :  { %v1432_v37 = vpop.f32.mrf.mxu1 }
 0x446   :  { %v1433_v44 = vadd.f32 %v1432_v37, %v1343_v47 }
 0x447   :  { %v1434_v39 = vpop.f32.mrf.mxu1 }
 0x448   :  { %v1435_v14 = vadd.f32 %v1434_v39, %v1345_v52 }
 0x449   :  { %v1608_v40 = vpop.f32.mrf.mxu1 }
 0x44b   :  { %v1610_v45 = vpop.f32.mrf.mxu1 }
 0x44c   :  { %v1689_v53 = vcombine.low %v1608_v40, %v1610_v45  ;;  %v1718_v45 = vsub.s32 1, %v2933_v13 }
 0x44e   :  { %v1682_v50 = vpop.f32.mrf.mxu1  ;;  %v1696_v58 = vrot.slane %v1689_v53, %v1695_v54 }
 0x450   :  { %v1684_v56 = vpop.f32.mrf.mxu1  ;;  %v1697_v20 = vcombine.high %v1696_v58, %v1696_v58  ;;  %v1704_v40 = vrot.slane %v1696_v58, %v1695_v54 }
 0x451   :  { %v1742_v49 = vcombine.low %v1682_v50, %v1684_v56 }
 0x452   :  { %v1711_v24 = vrot.slane %v1697_v20, %v1695_v54  ;;  %v1417_v20 = vadd.f32 %v1416_v27, %v1327_v26  ;;  %v1719_v31 = vrot.slane %v1704_v40, %v1718_v45 }
 0x453   :  { %v1749_v22 = vrot.slane %v1742_v49, %v1695_v54  ;;  %v1421_v49 = vadd.f32 %v1420_v28, %v1331_v29  ;;  %v3735_v29 = vmov 1.0  }
 0x454   :  { %v1503_v57 = vpop.f32.mrf.mxu0  ;;  %v1723_v10 = vrot.slane %v1711_v24, %v3295_v33  ;;  %v1727_v35 = vrot.slane %v1711_v24, %v1718_v45 }
 0x455   :  { %v1750_v42 = vcombine.high %v1749_v22, %v1749_v22  ;;  %v1757_v30 = vrot.slane %v1749_v22, %v1695_v54 }
 0x456   :  { %v1505_v0 = vpop.f32.mrf.mxu0 }
 0x457   :  { %v1764_v50 = vrot.slane %v1750_v42, %v1695_v54  ;;  %v1527_v13 = vadd.f32 %v1505_v0, %v1417_v20  ;;  %v1772_v0 = vrot.slane %v1757_v30, %v1718_v45  ;;  %v3736_v54 = vmov 0.0  }
 0x458   :  { %v1509_v51 = vpop.f32.mrf.mxu0 }
 0x459   :  { %v1528_v34 = vadd.f32 %v1509_v51, %v1421_v49  ;;  %v1780_v42 = vrot.slane %v1764_v50, %v1718_v45  ;;  %v1733_v22 = vmul.f32 %v1719_v31, %v1527_v13  ;;  %v3749_v45 = vld [vmem:[#allocation9_spill] sm:$0xff] }
 0x45a   :  { %v1511_v18 = vpop.f32.mrf.mxu0 }
 0x45b   :  { %v1529_v36 = vadd.f32 %v1511_v18, %v1423_v16 }
 0x45c   :  { %v1515_v32 = vpop.f32.mrf.mxu0 }
 0x45d   :  { %v1530_v11 = vadd.f32 %v1515_v32, %v1427_v15  ;;  %v1776_v32 = vrot.slane %v1764_v50, %v3295_v33  ;;  %v1735_v15 = vmul.f32 %v1719_v31, %v1529_v36  ;;  %v3751_v50 = vld [vmem:[#allocation11_spill] sm:$0xff] }
 0x45e   :  { %v1517_v19 = vpop.f32.mrf.mxu0 }
 0x45f   :  { %v1531_v53 = vadd.f32 %v1517_v19, %v1429_v17  ;;  %v1526_v17 = vadd.f32 %v1503_v57, %v1415_v12  ;;  %v1715_v19 = vrot.slane %v1704_v40, %v3295_v33  ;;  %v1736_v21 = vmul.f32 %v1723_v10, %v1530_v11 }
 0x460   :  { %v1521_v25 = vpop.f32.mrf.mxu0  ;;  %v1768_v12 = vrot.slane %v1757_v30, %v3295_v33  ;;  %v3571_v36 = vadd.f32 %v1772_v0, %v1735_v15  ;;  %v3577_v11 = vadd.f32 %v1772_v0, %v1733_v22 }
 0x461   :  { %v1532_v56 = vadd.f32 %v1521_v25, %v1433_v44  ;;  %v1737_v41 = vmul.f32 %v1727_v35, %v1531_v53  ;;  %v1734_v18 = vmul.f32 %v1715_v19, %v1528_v34  ;;  %v3750_v25 = vld [vmem:[#allocation10_spill] sm:$0xff] }
 0x462   :  { %v1523_v9 = vpop.f32.mrf.mxu0  ;;  %v1901_v57 = vmul.f32 %v3571_v36, %v3571_v36  ;;  %v1899_v24 = vmul.f32 %v3577_v11, %v3577_v11 }
 0x463   :  { %v1533_v37 = vadd.f32 %v1523_v9, %v1435_v14  ;;  %v1738_v38 = vmul.f32 %v1723_v10, %v1532_v56  ;;  %v3564_v51 = vadd.f32 %v1780_v42, %v1737_v41  ;;  %v1732_v9 = vmul.f32 %v1715_v19, %v1526_v17 }
 0x464   :  { %v3567_v14 = vadd.f32 %v1776_v32, %v1736_v21  ;;  %v3573_v10 = vadd.f32 %v1768_v12, %v1734_v18  ;;  %v1794_v21 = vld [vmem:[%s3691_s10] sm:$0x1] }
 0x465   :  { %v1739_v39 = vmul.f32 %v1727_v35, %v1533_v37  ;;  %v3561_v16 = vadd.f32 %v1776_v32, %v1738_v38  ;;  %v3579_v26 = vadd.f32 %v1768_v12, %v1732_v9  ;;  %v1903_v47 = vmul.f32 %v3564_v51, %v3564_v51 }
 0x466   :  { %v1902_v52 = vmul.f32 %v3567_v14, %v3567_v14  ;;  %v1900_v58 = vmul.f32 %v3573_v10, %v3573_v10 }
 0x467   :  { %v3559_v23 = vadd.f32 %v1780_v42, %v1739_v39  ;;  %v1904_v28 = vmul.f32 %v3561_v16, %v3561_v16  ;;  %v1898_v44 = vmul.f32 %v3579_v26, %v3579_v26  ;;  %v1793_v42 = vld [vmem:[%s3690_s9] sm:$0x1]  ;;  %s2801_s9 = smov [#allocation5]  }
 0x468   :  { %s2327_s10 = sshll.u32 %s2801_s9, 4  ;;  %s2328_s10 = int_to_ptr.vmem [resolvable:$true] %s2327_s10 }
 0x469   :  { %1851 = vmatprep.subr.mxu1 %v3559_v23  ;;  %v1905_v27 = vmul.f32 %v3559_v23, %v3559_v23  ;;  %s2770_s0 = scalar_lea.vmem %s2328_s10, 1024  ;;  %p2775_p6 = scmp.lt.s32.totalorder %s2328_s10, %s2328_s10 }
 0x46a   :  { %1852 = vmatpush1.msra.mxu1 %v3561_v16  ;;  %p2771_p5 = scmp.ne.s32.totalorder %s2328_s10, %s2770_s0  ;;  %p2776_p7 = scmp.lt.s32.totalorder %s2770_s0, %s2770_s0 }
 0x46b   :  { %1853 = vmatprep.subr.mxu1 %v3564_v51 }
 0x46c   :  { %1854 = vmatpush1.msra.mxu1 %v3567_v14  ;;  %p2777_p8 = por %p2776_p7, %p2775_p6 }
 0x46d   :  { %1855 = vmatprep.subr.mxu1 %v3571_v36 }
 0x46e   :  { %1856 = vmatpush1.msra.mxu1 %v3573_v10  ;;  %p2778_p9 = pnand %p2777_p8, %p2771_p5 }
 0x46f   :  { %1857 = vmatprep.subr.mxu1 %v3577_v11 }
 0x470   :  { %1858 = vmatpush1.msra.mxu1 %v3579_v26 }
 0x471   :  { %2380 = vmatmul.mubr.msk.f32.vlgmr.msra.gmra.mxu1 %vm147_vm1, %v3735_v29  ;;  %1930 = vmatprep.subr.mxu1 %v1905_v27 }
 0x472   :  { %1931 = vmatpush1.msra.mxu1 %v1904_v28  ;;  %1970 = vmatprep.mubr.f32.mxu1 %v3736_v54 }
 0x473   :  { %1932 = vmatprep.subr.mxu1 %v1903_v47 }
 0x474   :  { %1933 = vmatpush1.msra.mxu1 %v1902_v52 }
 0x475   :  { %1934 = vmatprep.subr.mxu1 %v1901_v57 }
 0x476   :  { %1935 = vmatpush1.msra.mxu1 %v1900_v58 }
 0x477   :  { %1936 = vmatprep.subr.mxu1 %v1899_v24 }
 0x478   :  { %1937 = vmatpush1.msra.mxu1 %v1898_v44 }
 0x479   :  { %2381 = vmatmul.mubr.msk.f32.vlgmr.msra.gmra.mxu1 %vm147_vm1, %v3735_v29  ;;  %2513 = vmatprep.subr.mxu1 %v3389_v62  ;;  %v3737_v62 = vld [vmem:[#allocation12_spill] sm:$0xff] }
 0x47a   :  { %2514 = vmatpush3.msra.mxu1 %v3394_v55  ;;  %v3738_v55 = vld [vmem:[#allocation13_spill] sm:$0xff] }
 0x47b   :  { %2515 = vmatprep.subr.mxu1 %v3399_v43  ;;  %v3739_v43 = vld [vmem:[#allocation14_spill] sm:$0xff] }
 0x47c   :  { %2516 = vmatpush3.msra.mxu1 %v3405_v4  ;;  %v3740_v4 = vld [vmem:[#allocation15_spill] sm:$0xff] }
 0x47d   :  { %2517 = vmatprep.subr.mxu1 %v3411_v59  ;;  %v3741_v59 = vld [vmem:[#allocation16_spill] sm:$0xff] }
 0x47e   :  { %2518 = vmatpush3.msra.mxu1 %v3417_v46  ;;  %v3742_v46 = vld [vmem:[#allocation17_spill] sm:$0xff] }
 0x47f   :  { %2519 = vmatprep.subr.mxu1 %v3423_v48  ;;  %v3743_v48 = vld [vmem:[#allocation18_spill] sm:$0xff] }
 0x480   :  { %2520 = vmatpush3.msra.mxu1 %v3429_v60  ;;  %v3744_v60 = vld [vmem:[#allocation19_spill] sm:$0xff] }
 0x481   :  { %2521 = vmatprep.subr.mxu1 %v3435_v61  ;;  %v3745_v61 = vld [vmem:[#allocation20_spill] sm:$0xff] }
 0x482   :  { %2522 = vmatpush3.msra.mxu1 %v3441_v63  ;;  %v3746_v63 = vld [vmem:[#allocation21_spill] sm:$0xff] }
 0x483   :  { %2523 = vmatprep.subr.mxu1 %v3447_v1  ;;  %v3747_v1 = vld [vmem:[#allocation22_spill] sm:$0xff] }
 0x484   :  { %2524 = vmatpush3.msra.mxu1 %v3453_v2  ;;  %v1812_v2 = vld [vmem:[%s3695_s14 + $0x88] sm:$0xff] }
 0x485   :  { %2525 = vmatprep.subr.mxu1 %v3459_v3  ;;  %v1796_v3 = vld [vmem:[%s3695_s14 + $0x8] sm:$0xff]  ;;  %2506 = vmatprep.subr.mxu0 %v1812_v2 }
 0x486   :  { %2526 = vmatpush3.msra.mxu1 %v3465_v5  ;;  %2507 = vmatpush3.msra.mxu0 %v1796_v3  ;;  %v1811_v5 = vld [vmem:[%s3695_s14 + $0x80] sm:$0xff] }
 0x487   :  { %2527 = vmatprep.subr.mxu1 %v3471_v6  ;;  %v1795_v6 = vld [vmem:[%s3695_s14] sm:$0xff]  ;;  %2508 = vmatprep.subr.mxu0 %v1811_v5 }
 0x488   :  { %2528 = vmatpush3.msra.mxu1 %v3477_v7  ;;  %2509 = vmatpush3.msra.mxu0 %v1795_v6  ;;  %v3748_v7 = vld [vmem:[#allocation8_spill] sm:$0xff] }
 0x489   :  { %2529 = vmatprep.subr.mxu1 %v3483_v8  ;;  %2157 = vmatprep.subr.mxu0 %v3748_v7 }
 0x48a   :  { %2530 = vmatpush3.msra.mxu1 %v3737_v62 }
 0x48b   :  { %2531 = vmatprep.subr.mxu1 %v3738_v55 }
 0x48c   :  { %2532 = vmatpush3.msra.mxu1 %v3739_v43 }
 0x48d   :  { %2533 = vmatprep.subr.mxu1 %v3740_v4 }
 0x48e   :  { %2534 = vmatpush3.msra.mxu1 %v3741_v59 }
 0x48f   :  { %2535 = vmatprep.subr.mxu1 %v3742_v46 }
 0x490   :  { %2536 = vmatpush3.msra.mxu1 %v3743_v48 }
 0x491   :  { %2537 = vmatprep.subr.mxu1 %v3744_v60 }
 0x492   :  { %2538 = vmatpush3.msra.mxu1 %v3745_v61 }
 0x493   :  { %2539 = vmatprep.subr.mxu1 %v3746_v63 }
 0x494   :  { %2540 = vmatpush3.msra.mxu1 %v3747_v1 }
 0x495   :  { %2541 = vmatprep.subr.mxu1 %v1812_v2 }
 0x496   :  { %2542 = vmatpush3.msra.mxu1 %v1796_v3 }
 0x497   :  { %2543 = vmatprep.subr.mxu1 %v1811_v5 }
 0x498   :  { %2544 = vmatpush3.msra.mxu1 %v1795_v6 }
 0x531   :  { %v1893_v8 = vpop.f32.mrf.mxu1 }
 0x533   :  { %v1895_v40 = vpop.f32.mrf.mxu1 }
 0x534   :  { %2041 = vmatprep.mubr.f32.mxu0 %v1895_v40 }
 0x535   :  { %2042 = vmatmul.mubr.f32.vlgmr.msra.gmra.mxu0 %v1893_v8 }
 0x536   :  { %2158 = vmatpush1.msra.mxu0 %v3749_v45  ;;  %2193 = vmatprep.mubr.f32.mxu0 %v3736_v54 }
 0x537   :  { %2159 = vmatprep.subr.mxu0 %v3750_v25 }
 0x538   :  { %2160 = vmatpush1.msra.mxu0 %v3751_v50 }
 0x539   :  { %v1972_v53 = vpop.f32.mrf.mxu1  ;;  %2231 = vmatprep.subr.mxu0 %v3748_v7 }
 0x53b   :  { %v1974_v56 = vpop.f32.mrf.mxu1 }
 0x53c   :  { %2112 = vmatprep.mubr.f32.mxu1 %v1974_v56 }
 0x53d   :  { %2113 = vmatmul.mubr.f32.vlgmr.msra.gmra.mxu1 %v1972_v53 }
 0x5f5   :  { %v2510_v49 = vpop.f32.mrf.mxu0 }
 0x5f7   :  { %v2511_v20 = vpop.f32.mrf.mxu0 }
 0x5f8   :  { %v2512_v35 = vadd.f32 %v2511_v20, %v2510_v49 }
 0x5fa   :  { %v2047_v30 = vmul.f32 0.001953125, %v2512_v35 }
 0x5fc   :  { %v2119_v38 = vmul.f32 %v2047_v30, %v2047_v30 }
 0x5fd   :  { %v2545_v37 = vpop.f32.mrf.mxu1 }
 0x5ff   :  { %v2546_v31 = vpop.f32.mrf.mxu1 }
 0x600   :  { %v2547_v34 = vadd.f32 %v2546_v31, %v2545_v37 }
 0x602   :  { %v2118_v13 = vmul.f32 0.001953125, %v2547_v34 }
 0x604   :  { %v2120_v41 = vsub.f32 %v2118_v13, %v2119_v38 }
 0x606   :  { %v2121_v39 = vadd.f32 1e-05, %v2120_v41 }
 0x608   :  { %2748 = vrsqrt.f32 %v2121_v39 }
 0x615   :  { %v2749_v17 = vpop.eup %2748 }
 0x616   :  { %v2123_v19 = vmul.f32 %v2749_v17, %v1793_v42 }
 0x618   :  { %2382 = vmatmul.mubr.msk.f32.vlgmr.msra.gmra.mxu0 %vm1538_vm10, %v2123_v19  ;;  %v2124_v32 = vmul.f32 %v2123_v19, %v2047_v30 }
 0x619   :  { %2232 = vmatpush1.msra.mxu0 %v3749_v45  ;;  %2267 = vmatprep.mubr.f32.mxu0 %v3736_v54 }
 0x61a   :  { %2233 = vmatprep.subr.mxu0 %v3750_v25  ;;  %v2125_v15 = vsub.f32 %v1794_v21, %v2124_v32 }
 0x61b   :  { %2234 = vmatpush1.msra.mxu0 %v3751_v50 }
 0x61c   :  { %2383 = vmatmul.mubr.msk.f32.vlgmr.msra.gmra.mxu0 %vm1538_vm10, %v2125_v15 }
 0x6d8   :  { %v2195_v18 = vpop.f32.mrf.mxu0 }
 0x6d9   :  { %v2277_v22 = vrot.slane %v2195_v18, %v3295_v33 }
 0x6da   :  { %v2197_v0 = vpop.f32.mrf.mxu0 }
 0x6db   :  { %v2282_v9 = vmul.f32 %v2277_v22, %v3579_v26  ;;  %v2281_v12 = vrot.slane %v2197_v0, %v3295_v33  ;;  %v2284_v28 = vmul.f32 %v2277_v22, %v3573_v10  ;;  %v2286_v29 = vmul.f32 %v2277_v22, %v3567_v14 }
 0x6dc   :  { %v2269_v27 = vpop.f32.mrf.mxu0  ;;  %v2288_v47 = vmul.f32 %v2277_v22, %v3561_v16 }
 0x6dd   :  { %v2293_v52 = vrot.slane %v2269_v27, %v3295_v33  ;;  %v2283_v54 = vmul.f32 %v2281_v12, %v3577_v11  ;;  %v2285_v26 = vmul.f32 %v2281_v12, %v3571_v36  ;;  %v2287_v55 = vmul.f32 %v2281_v12, %v3564_v51 }
 0x6de   :  { %v2271_v57 = vpop.f32.mrf.mxu0  ;;  %v2289_v43 = vmul.f32 %v2281_v12, %v3559_v23 }
 0x6df   :  { %v2298_v58 = vadd.f32 %v2293_v52, %v2282_v9  ;;  %v2300_v24 = vadd.f32 %v2293_v52, %v2284_v28  ;;  %v2302_v44 = vadd.f32 %v2293_v52, %v2286_v29  ;;  %v2304_v62 = vadd.f32 %v2293_v52, %v2288_v47 }
 0x6e0   :  { %v2297_v10 = vrot.slane %v2271_v57, %v3295_v33 }
 0x6e1   :  { %v2306_v14 = vmax.f32 %v2298_v58, 0.0  ;;  %v2308_v4 = vmax.f32 %v2300_v24, 0.0  ;;  %v2310_v16 = vmax.f32 %v2302_v44, 0.0  ;;  %v2312_v59 = vmax.f32 %v2304_v62, 0.0 }
 0x6e2   :  { %v2299_v11 = vadd.f32 %v2297_v10, %v2283_v54  ;;  %v2301_v46 = vadd.f32 %v2297_v10, %v2285_v26  ;;  %v2303_v48 = vadd.f32 %v2297_v10, %v2287_v55  ;;  %v2305_v60 = vadd.f32 %v2297_v10, %v2289_v43 }
 0x6e3   :  { %2314 = vst [vmem:[#allocation5] sm:$0xff] %v2306_v14  ;;  %2316 = vst [vmem:[#allocation5 + $0x10] sm:$0xff] %v2308_v4 }
 0x6e4   :  { %2318 = vst [vmem:[#allocation5 + $0x20] sm:$0xff] %v2310_v16  ;;  %2320 = vst [vmem:[#allocation5 + $0x30] sm:$0xff] %v2312_v59  ;;  %v2307_v36 = vmax.f32 %v2299_v11, 0.0  ;;  %v2309_v51 = vmax.f32 %v2301_v46, 0.0  ;;  %v2311_v61 = vmax.f32 %v2303_v48, 0.0  ;;  %v2313_v23 = vmax.f32 %v2305_v60, 0.0 }
 0x6e6   :  { %2315 = vst [vmem:[#allocation5 + $0x8] sm:$0xff] %v2307_v36  ;;  %2317 = vst [vmem:[#allocation5 + $0x18] sm:$0xff] %v2309_v51 }
 0x6e7   :  { %2319 = vst [vmem:[#allocation5 + $0x28] sm:$0xff] %v2311_v61  ;;  %2321 = vst [vmem:[#allocation5 + $0x38] sm:$0xff] %v2313_v23 }
 0x6e8   :  { %2781 = shalt.err (!%p2778_p9)
}
 0x6e9   :  { %2333 = dma.vmem_to_hbm [thread:$0]  %s2328_s10, 1024, %s3696_s15, [#allocation4], %s2795_s21, %s2795_s21, %s2796_s22  }
 0x6ea   :  { %2792 = dma.done.wait [#allocation4], 1024  }
 0x6eb   :  { %2793 = vsyncadd [#allocation4], 4294966272 }
 0x6ec   :  { %2337 = vsyncpa [#allocation3], 1 }
 0x6ed   :  { %2338 = vsyncpa [#allocation4], 1 }

</bundles_post_ra>
